<compile_context>
chip_gen: v6e
topology: v6e:2x2x1
jax: 0.10.0
libtpu: 0.0.40
codegen_flags: <defaults>
</compile_context>

<pallas_src>
import jax
import jax.numpy as jnp
from jax.experimental import pallas as pl
from jax.experimental.pallas import tpu as pltpu


def _round_up(x, m):
    return ((x + m - 1) // m) * m


def cls_encoder_kernel(ids_ref, mask_ref, tok_ref, pos_ref,
                       wq_ref, wk_ref, wv_ref, wo_ref,
                       w1_ref, w2_ref, ln_ref, o_ref):
    """Fused embedding lookup + one BERT-style encoder layer, CLS row only."""
    TB, L = ids_ref.shape
    V, D = tok_ref.shape          # V is the (lane-padded) vocab size

    # ---- fused embedding lookup: one-hot MXU matmul against the VMEM-resident
    #      token table, plus positional add --------------------------------
    ids = ids_ref[...]                                            # (TB, L) int32
    vocab_iota = jax.lax.broadcasted_iota(jnp.int32, (TB, L, V), 2)
    onehot = (ids[:, :, None] == vocab_iota).astype(jnp.bfloat16)  # (TB, L, V)
    x_flat = jnp.dot(onehot.reshape(TB * L, V), tok_ref[...],
                     preferred_element_type=jnp.float32)           # (TB*L, D) f32
    x = x_flat.reshape(TB, L, D) + pos_ref[...][None, :, :]        # (TB, L, D) f32

    mask = mask_ref[...]                                           # (TB, L) f32
    x_cls = x[:, 0, :]                                             # (TB, D) f32 residual
    x_flat_bf = x.astype(jnp.bfloat16).reshape(TB * L, D)

    # ---- K / V projections over all tokens (two lane-aligned matmuls) -----
    k = jnp.dot(x_flat_bf, wk_ref[...],
                preferred_element_type=jnp.float32).reshape(TB, L, D)
    v = jnp.dot(x_flat_bf, wv_ref[...],
                preferred_element_type=jnp.float32).reshape(TB, L, D)

    # ---- CLS-only query ----------------------------------------------------
    q = jnp.dot(x_cls.astype(jnp.bfloat16), wq_ref[...],
                preferred_element_type=jnp.float32)                # (TB, D) f32

    scale = 1.0 / jnp.sqrt(jnp.float32(D))
    if L <= 8:
        # Tiny L fits one sublane tile: VPU broadcast-multiply + reduce is
        # cheaper than TB independent M=1 MXU matmuls.
        s = jnp.sum(q[:, None, :] * k, axis=-1) * scale            # (TB, L)
    else:
        s = jnp.einsum('bqd,bkd->bqk',
                       q[:, None, :].astype(jnp.bfloat16),
                       k.astype(jnp.bfloat16),
                       preferred_element_type=jnp.float32)[:, 0, :] * scale

    s = s + (1.0 - mask) * (-1e9)                                  # key mask
    s = s - jnp.max(s, axis=-1, keepdims=True)
    p = jnp.exp(s)
    p = p * pl.reciprocal(jnp.sum(p, axis=-1, keepdims=True), approx=True)

    if L <= 8:
        attn = jnp.sum(p[:, :, None] * v, axis=1)                  # (TB, D)
    else:
        attn = jnp.einsum('bqk,bkd->bqd',
                          p[:, None, :].astype(jnp.bfloat16),
                          v.astype(jnp.bfloat16),
                          preferred_element_type=jnp.float32)[:, 0, :]

    attn = jnp.dot(attn.astype(jnp.bfloat16), wo_ref[...],
                   preferred_element_type=jnp.float32)

    ln = ln_ref[...]                                               # (4, D): g1,b1,g2,b2

    def layer_norm(h, gamma, beta):
        mu = jnp.mean(h, axis=-1, keepdims=True)
        var = jnp.mean((h - mu) ** 2, axis=-1, keepdims=True)
        return (h - mu) * jax.lax.rsqrt(var + 1e-12) * gamma + beta

    h = layer_norm(x_cls + attn, ln[0:1, :], ln[1:2, :])

    # ---- feed-forward (CLS rows only) --------------------------------------
    ff = jnp.dot(h.astype(jnp.bfloat16), w1_ref[...],
                 preferred_element_type=jnp.float32)
    ff = jax.nn.gelu(ff, approximate=True)
    ff = jnp.dot(ff.astype(jnp.bfloat16), w2_ref[...],
                 preferred_element_type=jnp.float32)

    o_ref[...] = layer_norm(h + ff, ln[2:3, :], ln[3:4, :])        # (TB, D)


def bert_cls_embedding(token_ids, mask_f32, params, tb=256):
    """Runs the fused Pallas encoder layer.

    token_ids: [B, L] int32, mask_f32: [B, L] f32 (1 keep / 0 pad).
    Returns the CLS (position 0) hidden state, shape [B, D] f32.
    """
    B, L = token_ids.shape
    V, D = params["tok_emb"].shape
    Dff = params["w1"].shape[1]

    # Generation-aware VMEM cap: ~3/4 of physical, capped at 96 MiB
    # (v5e/v6e: 96 MiB of 128 MiB; v7x: ~48 MiB of 64 MiB).
    try:
        vmem_cap = pltpu.get_tpu_info().vmem_capacity_bytes
    except Exception:
        vmem_cap = 64 * 1024 * 1024
    vmem_limit = int(min(96 * 1024 * 1024, (vmem_cap * 3) // 4))

    # Batch tile: as large as requested, clamped by the (padded) batch and by
    # a rough in-kernel activation budget (x/k/v f32 slabs + onehot/FFN temps).
    bytes_per_seq = L * D * 4 * 8 + L * max(_round_up(V, 128), 4 * Dff) * 2
    tb_cap = max(8, ((vmem_limit // 4) // bytes_per_seq) // 8 * 8)
    tb = int(max(8, min(tb, tb_cap, _round_up(B, 8))))

    B_pad = _round_up(B, tb)
    if B_pad != B:
        token_ids = jnp.pad(token_ids, ((0, B_pad - B), (0, 0)))
        mask_f32 = jnp.pad(mask_f32, ((0, B_pad - B), (0, 0)))

    # Pad vocab axis to a lane multiple so the one-hot matmul is aligned.
    V_pad = _round_up(V, 128)
    tok_emb = params["tok_emb"]
    if V_pad != V:
        tok_emb = jnp.pad(tok_emb, ((0, V_pad - V), (0, 0)))

    def full_spec(shape):
        zeros = (0,) * len(shape)
        return pl.BlockSpec(shape, lambda b, _z=zeros: _z)

    # NOTE: at real BERT sizes, add pipeline_mode=pl.Buffered(1) to the weight
    # specs below (constant index_map) to avoid double-buffering them — at the
    # demo D=32 the weight footprint is negligible so it is omitted here.
    out = pl.pallas_call(
        cls_encoder_kernel,
        out_shape=jax.ShapeDtypeStruct((B_pad, D), jnp.float32),
        grid_spec=pltpu.PrefetchScalarGridSpec(
            num_scalar_prefetch=0,
            grid=(B_pad // tb,),
            in_specs=[
                pl.BlockSpec((tb, L), lambda b: (b, 0)),   # token ids (int32)
                pl.BlockSpec((tb, L), lambda b: (b, 0)),   # attention mask (f32)
                full_spec((V_pad, D)),                     # token embedding (bf16)
                full_spec((L, D)),                         # positional emb (f32)
                full_spec((D, D)),                         # Wq  (bf16)
                full_spec((D, D)),                         # Wk  (bf16)
                full_spec((D, D)),                         # Wv  (bf16)
                full_spec((D, D)),                         # Wo  (bf16)
                full_spec((D, Dff)),                       # W1  (bf16)
                full_spec((Dff, D)),                       # W2  (bf16)
                full_spec((4, D)),                         # LayerNorm params (f32)
            ],
            out_specs=pl.BlockSpec((tb, D), lambda b: (b, 0)),
        ),
        compiler_params=pltpu.CompilerParams(
            dimension_semantics=("parallel",),
            vmem_limit_bytes=vmem_limit,
        ),
    )(token_ids, mask_f32, tok_emb,
      params["pos_emb"], params["wq"], params["wk"], params["wv"],
      params["wo"], params["w1"], params["w2"], params["ln"])

    return out[:B]


def review_embedding_forward(knowledge_token, knowledge_mask, params):
    """Mirrors ReviewEmbedding.forward: CLS embedding of each review."""
    mask_f32 = knowledge_mask.astype(jnp.float32)                  # [B, L]
    return bert_cls_embedding(knowledge_token.astype(jnp.int32),
                              mask_f32, params)                    # [B, D]


def make_params(key, vocab_size, max_review_len, token_emb_dim, ffn_dim):
    ks = jax.random.split(key, 8)
    D, Dff = token_emb_dim, ffn_dim
    scale = 0.02
    ln = jnp.concatenate(
        [jnp.ones((1, D), jnp.float32), jnp.zeros((1, D), jnp.float32),
         jnp.ones((1, D), jnp.float32), jnp.zeros((1, D), jnp.float32)], axis=0)
    return {
        "tok_emb": (scale * jax.random.normal(ks[0], (vocab_size, D),
                                              jnp.float32)).astype(jnp.bfloat16),
        "pos_emb": scale * jax.random.normal(ks[1], (max_review_len, D), jnp.float32),
        "wq": (scale * jax.random.normal(ks[2], (D, D), jnp.float32)).astype(jnp.bfloat16),
        "wk": (scale * jax.random.normal(ks[3], (D, D), jnp.float32)).astype(jnp.bfloat16),
        "wv": (scale * jax.random.normal(ks[4], (D, D), jnp.float32)).astype(jnp.bfloat16),
        "wo": (scale * jax.random.normal(ks[5], (D, D), jnp.float32)).astype(jnp.bfloat16),
        "w1": (scale * jax.random.normal(ks[6], (D, Dff), jnp.float32)).astype(jnp.bfloat16),
        "w2": (scale * jax.random.normal(ks[7], (Dff, D), jnp.float32)).astype(jnp.bfloat16),
        "ln": ln,
    }


if __name__ == "__main__":
    # Small shapes consistent with the module's __init__ arguments.
    num_reviews = 2         # batch of reviews
    max_review_len = 8      # sequence length
    token_emb_dim = 32      # hidden size
    ffn_dim = 64
    vocab_size = 100

    key = jax.random.PRNGKey(0)
    k_tok, k_params = jax.random.split(key)

    knowledge_token = jax.random.randint(
        k_tok, (num_reviews, max_review_len), 0, vocab_size, dtype=jnp.int32)
    # mask: first 6 tokens valid, last 2 padded.
    knowledge_mask = jnp.concatenate(
        [jnp.ones((num_reviews, 6), jnp.int32),
         jnp.zeros((num_reviews, 2), jnp.int32)], axis=1)

    params = make_params(k_params, vocab_size, max_review_len,
                         token_emb_dim, ffn_dim)

    cls_emb = review_embedding_forward(knowledge_token, knowledge_mask, params)
    jax.block_until_ready(cls_emb)

    # Match the PyTorch module's return type (.tolist()) on the host side.
    knowledge_rep = jax.device_get(cls_emb).tolist()
    assert len(knowledge_rep) == num_reviews
    assert len(knowledge_rep[0]) == token_emb_dim
    assert all(all(v == v for v in row) for row in knowledge_rep)  # finite

    print("KERNEL_OK")
</pallas_src>

<mosaic_0001>
module attributes {stable_mosaic.version = 11 : i64} {
  func.func @cls_encoder_kernel(%arg0: i32, %arg1: memref<8x8xi32, #tpu.memory_space<vmem>>, %arg2: memref<8x8xf32, #tpu.memory_space<vmem>>, %arg3: memref<128x32xbf16, #tpu.memory_space<vmem>>, %arg4: memref<8x32xf32, #tpu.memory_space<vmem>>, %arg5: memref<32x32xbf16, #tpu.memory_space<vmem>>, %arg6: memref<32x32xbf16, #tpu.memory_space<vmem>>, %arg7: memref<32x32xbf16, #tpu.memory_space<vmem>>, %arg8: memref<32x32xbf16, #tpu.memory_space<vmem>>, %arg9: memref<32x64xbf16, #tpu.memory_space<vmem>>, %arg10: memref<64x32xbf16, #tpu.memory_space<vmem>>, %arg11: memref<4x32xf32, #tpu.memory_space<vmem>>, %arg12: memref<8x32xf32, #tpu.memory_space<vmem>>) attributes {dimension_semantics = [#tpu.dimension_semantics<parallel>], iteration_bounds = array<i64: 1>, scalar_prefetch = 0 : i64, scratch_operands = 0 : i64, tpu.core_type = #tpu.core_type<tc>, window_params = [{transform_indices = @transform_0, window_bounds = array<i64: 8, 8>}, {transform_indices = @transform_1, window_bounds = array<i64: 8, 8>}, {pipeline_mode = #tpu.pipeline_mode<synchronous>, transform_indices = @transform_2, window_bounds = array<i64: 128, 32>}, {pipeline_mode = #tpu.pipeline_mode<synchronous>, transform_indices = @transform_3, window_bounds = array<i64: 8, 32>}, {pipeline_mode = #tpu.pipeline_mode<synchronous>, transform_indices = @transform_4, window_bounds = array<i64: 32, 32>}, {pipeline_mode = #tpu.pipeline_mode<synchronous>, transform_indices = @transform_5, window_bounds = array<i64: 32, 32>}, {pipeline_mode = #tpu.pipeline_mode<synchronous>, transform_indices = @transform_6, window_bounds = array<i64: 32, 32>}, {pipeline_mode = #tpu.pipeline_mode<synchronous>, transform_indices = @transform_7, window_bounds = array<i64: 32, 32>}, {pipeline_mode = #tpu.pipeline_mode<synchronous>, transform_indices = @transform_8, window_bounds = array<i64: 32, 64>}, {pipeline_mode = #tpu.pipeline_mode<synchronous>, transform_indices = @transform_9, window_bounds = array<i64: 64, 32>}, {pipeline_mode = #tpu.pipeline_mode<synchronous>, transform_indices = @transform_10, window_bounds = array<i64: 4, 32>}, {transform_indices = @transform_11, window_bounds = array<i64: 8, 32>}]} {
    %c0 = arith.constant 0 : index
    %c0_0 = arith.constant 0 : index
    %0 = vector.load %arg1[%c0, %c0_0] : memref<8x8xi32, #tpu.memory_space<vmem>>, vector<8x8xi32>
    %1 = tpu.iota {dimensions = array<i32: 2>} : vector<8x8x128xi32>
    %2 = vector.shape_cast %0 : vector<8x8xi32> to vector<8x8x1xi32>
    %3 = vector.broadcast %2 : vector<8x8x1xi32> to vector<8x8x128xi32>
    %4 = arith.cmpi eq, %3, %1 : vector<8x8x128xi32>
    %5 = arith.extui %4 : vector<8x8x128xi1> to vector<8x8x128xi32>
    %6 = arith.sitofp %5 : vector<8x8x128xi32> to vector<8x8x128xf32>
    %7 = arith.truncf %6 : vector<8x8x128xf32> to vector<8x8x128xbf16>
    %8 = vector.shape_cast %7 : vector<8x8x128xbf16> to vector<64x128xbf16>
    %c0_1 = arith.constant 0 : index
    %c0_2 = arith.constant 0 : index
    %9 = vector.load %arg3[%c0_1, %c0_2] : memref<128x32xbf16, #tpu.memory_space<vmem>>, vector<128x32xbf16>
    %cst = arith.constant dense<0.000000e+00> : vector<64x32xf32>
    %10 = tpu.matmul %8, %9, %cst {dimension_numbers = #tpu.dot_dimension_numbers<[1], [0], [0], [1], [0, 0, 1, 1], [], []>} : vector<64x128xbf16>, vector<128x32xbf16>, vector<64x32xf32> -> vector<64x32xf32>
    %11 = vector.shape_cast %10 : vector<64x32xf32> to vector<8x8x32xf32>
    %c0_3 = arith.constant 0 : index
    %c0_4 = arith.constant 0 : index
    %12 = vector.load %arg4[%c0_3, %c0_4] : memref<8x32xf32, #tpu.memory_space<vmem>>, vector<8x32xf32>
    %13 = vector.shape_cast %12 : vector<8x32xf32> to vector<1x8x32xf32>
    %14 = vector.broadcast %13 : vector<1x8x32xf32> to vector<8x8x32xf32>
    %15 = arith.addf %11, %14 : vector<8x8x32xf32>
    %c0_5 = arith.constant 0 : index
    %c0_6 = arith.constant 0 : index
    %16 = vector.load %arg2[%c0_5, %c0_6] : memref<8x8xf32, #tpu.memory_space<vmem>>, vector<8x8xf32>
    %17 = vector.extract_strided_slice %15 {offsets = [0, 0, 0], sizes = [8, 1, 32], strides = [1, 1, 1]} : vector<8x8x32xf32> to vector<8x1x32xf32>
    %18 = vector.shape_cast %17 : vector<8x1x32xf32> to vector<8x32xf32>
    %19 = arith.truncf %15 : vector<8x8x32xf32> to vector<8x8x32xbf16>
    %20 = vector.shape_cast %19 : vector<8x8x32xbf16> to vector<64x32xbf16>
    %c0_7 = arith.constant 0 : index
    %c0_8 = arith.constant 0 : index
    %21 = vector.load %arg6[%c0_7, %c0_8] : memref<32x32xbf16, #tpu.memory_space<vmem>>, vector<32x32xbf16>
    %cst_9 = arith.constant dense<0.000000e+00> : vector<64x32xf32>
    %22 = tpu.matmul %20, %21, %cst_9 {dimension_numbers = #tpu.dot_dimension_numbers<[1], [0], [0], [1], [0, 0, 1, 1], [], []>} : vector<64x32xbf16>, vector<32x32xbf16>, vector<64x32xf32> -> vector<64x32xf32>
    %23 = vector.shape_cast %22 : vector<64x32xf32> to vector<8x8x32xf32>
    %c0_10 = arith.constant 0 : index
    %c0_11 = arith.constant 0 : index
    %24 = vector.load %arg7[%c0_10, %c0_11] : memref<32x32xbf16, #tpu.memory_space<vmem>>, vector<32x32xbf16>
    %cst_12 = arith.constant dense<0.000000e+00> : vector<64x32xf32>
    %25 = tpu.matmul %20, %24, %cst_12 {dimension_numbers = #tpu.dot_dimension_numbers<[1], [0], [0], [1], [0, 0, 1, 1], [], []>} : vector<64x32xbf16>, vector<32x32xbf16>, vector<64x32xf32> -> vector<64x32xf32>
    %26 = vector.shape_cast %25 : vector<64x32xf32> to vector<8x8x32xf32>
    %27 = arith.truncf %18 : vector<8x32xf32> to vector<8x32xbf16>
    %c0_13 = arith.constant 0 : index
    %c0_14 = arith.constant 0 : index
    %28 = vector.load %arg5[%c0_13, %c0_14] : memref<32x32xbf16, #tpu.memory_space<vmem>>, vector<32x32xbf16>
    %cst_15 = arith.constant dense<0.000000e+00> : vector<8x32xf32>
    %29 = tpu.matmul %27, %28, %cst_15 {dimension_numbers = #tpu.dot_dimension_numbers<[1], [0], [0], [1], [0, 0, 1, 1], [], []>} : vector<8x32xbf16>, vector<32x32xbf16>, vector<8x32xf32> -> vector<8x32xf32>
    %cst_16 = arith.constant 3.200000e+01 : f32
    %30 = math.sqrt %cst_16 : f32
    %cst_17 = arith.constant 1.000000e+00 : f32
    %31 = arith.divf %cst_17, %30 : f32
    %32 = vector.shape_cast %29 : vector<8x32xf32> to vector<8x1x32xf32>
    %33 = vector.broadcast %32 : vector<8x1x32xf32> to vector<8x8x32xf32>
    %34 = arith.mulf %33, %23 : vector<8x8x32xf32>
    %cst_18 = arith.constant dense<0.000000e+00> : vector<8x8xf32>
    %35 = vector.multi_reduction <add>, %34, %cst_18 [2] : vector<8x8x32xf32> to vector<8x8xf32>
    %36 = vector.broadcast %31 : f32 to vector<8x8xf32>
    %37 = arith.mulf %35, %36 : vector<8x8xf32>
    %cst_19 = arith.constant 1.000000e+00 : f32
    %38 = vector.broadcast %cst_19 : f32 to vector<8x8xf32>
    %39 = arith.subf %38, %16 : vector<8x8xf32>
    %cst_20 = arith.constant -1.000000e+09 : f32
    %40 = vector.broadcast %cst_20 : f32 to vector<8x8xf32>
    %41 = arith.mulf %39, %40 : vector<8x8xf32>
    %42 = arith.addf %37, %41 : vector<8x8xf32>
    %cst_21 = arith.constant dense<0xFF800000> : vector<8xf32>
    %43 = vector.multi_reduction <maximumf>, %42, %cst_21 [1] : vector<8x8xf32> to vector<8xf32>
    %44 = vector.shape_cast %43 : vector<8xf32> to vector<8x1xf32>
    %45 = vector.broadcast %44 : vector<8x1xf32> to vector<8x8xf32>
    %46 = arith.subf %42, %45 : vector<8x8xf32>
    %47 = math.exp %46 : vector<8x8xf32>
    %cst_22 = arith.constant dense<0.000000e+00> : vector<8xf32>
    %48 = vector.multi_reduction <add>, %47, %cst_22 [1] : vector<8x8xf32> to vector<8xf32>
    %49 = vector.shape_cast %48 : vector<8xf32> to vector<8x1xf32>
    %50 = tpu.reciprocal %49 {approx = true} : vector<8x1xf32> -> vector<8x1xf32>
    %51 = vector.broadcast %50 : vector<8x1xf32> to vector<8x8xf32>
    %52 = arith.mulf %47, %51 : vector<8x8xf32>
    %53 = vector.shape_cast %52 : vector<8x8xf32> to vector<8x8x1xf32>
    %54 = vector.broadcast %53 : vector<8x8x1xf32> to vector<8x8x32xf32>
    %55 = arith.mulf %54, %26 : vector<8x8x32xf32>
    %cst_23 = arith.constant dense<0.000000e+00> : vector<8x32xf32>
    %56 = vector.multi_reduction <add>, %55, %cst_23 [1] : vector<8x8x32xf32> to vector<8x32xf32>
    %57 = arith.truncf %56 : vector<8x32xf32> to vector<8x32xbf16>
    %c0_24 = arith.constant 0 : index
    %c0_25 = arith.constant 0 : index
    %58 = vector.load %arg8[%c0_24, %c0_25] : memref<32x32xbf16, #tpu.memory_space<vmem>>, vector<32x32xbf16>
    %cst_26 = arith.constant dense<0.000000e+00> : vector<8x32xf32>
    %59 = tpu.matmul %57, %58, %cst_26 {dimension_numbers = #tpu.dot_dimension_numbers<[1], [0], [0], [1], [0, 0, 1, 1], [], []>} : vector<8x32xbf16>, vector<32x32xbf16>, vector<8x32xf32> -> vector<8x32xf32>
    %c0_27 = arith.constant 0 : index
    %c0_28 = arith.constant 0 : index
    %60 = vector.load %arg11[%c0_27, %c0_28] : memref<4x32xf32, #tpu.memory_space<vmem>>, vector<4x32xf32>
    %61 = arith.addf %18, %59 : vector<8x32xf32>
    %62 = vector.extract_strided_slice %60 {offsets = [0, 0], sizes = [1, 32], strides = [1, 1]} : vector<4x32xf32> to vector<1x32xf32>
    %63 = vector.extract_strided_slice %60 {offsets = [1, 0], sizes = [1, 32], strides = [1, 1]} : vector<4x32xf32> to vector<1x32xf32>
    %cst_29 = arith.constant dense<0.000000e+00> : vector<8xf32>
    %64 = vector.multi_reduction <add>, %61, %cst_29 [1] : vector<8x32xf32> to vector<8xf32>
    %65 = vector.shape_cast %64 : vector<8xf32> to vector<8x1xf32>
    %cst_30 = arith.constant 3.200000e+01 : f32
    %66 = vector.broadcast %cst_30 : f32 to vector<8x1xf32>
    %67 = arith.divf %65, %66 : vector<8x1xf32>
    %68 = vector.broadcast %67 : vector<8x1xf32> to vector<8x32xf32>
    %69 = arith.subf %61, %68 : vector<8x32xf32>
    %70 = arith.mulf %69, %69 : vector<8x32xf32>
    %cst_31 = arith.constant dense<0.000000e+00> : vector<8xf32>
    %71 = vector.multi_reduction <add>, %70, %cst_31 [1] : vector<8x32xf32> to vector<8xf32>
    %72 = vector.shape_cast %71 : vector<8xf32> to vector<8x1xf32>
    %cst_32 = arith.constant 3.200000e+01 : f32
    %73 = vector.broadcast %cst_32 : f32 to vector<8x1xf32>
    %74 = arith.divf %72, %73 : vector<8x1xf32>
    %75 = vector.broadcast %67 : vector<8x1xf32> to vector<8x32xf32>
    %76 = arith.subf %61, %75 : vector<8x32xf32>
    %cst_33 = arith.constant 9.99999996E-13 : f32
    %77 = vector.broadcast %cst_33 : f32 to vector<8x1xf32>
    %78 = arith.addf %74, %77 : vector<8x1xf32>
    %79 = math.rsqrt %78 : vector<8x1xf32>
    %80 = vector.broadcast %79 : vector<8x1xf32> to vector<8x32xf32>
    %81 = arith.mulf %76, %80 : vector<8x32xf32>
    %82 = vector.broadcast %62 : vector<1x32xf32> to vector<8x32xf32>
    %83 = arith.mulf %81, %82 : vector<8x32xf32>
    %84 = vector.broadcast %63 : vector<1x32xf32> to vector<8x32xf32>
    %85 = arith.addf %83, %84 : vector<8x32xf32>
    %86 = arith.truncf %85 : vector<8x32xf32> to vector<8x32xbf16>
    %c0_34 = arith.constant 0 : index
    %c0_35 = arith.constant 0 : index
    %87 = vector.load %arg9[%c0_34, %c0_35] : memref<32x64xbf16, #tpu.memory_space<vmem>>, vector<32x64xbf16>
    %cst_36 = arith.constant dense<0.000000e+00> : vector<8x64xf32>
    %88 = tpu.matmul %86, %87, %cst_36 {dimension_numbers = #tpu.dot_dimension_numbers<[1], [0], [0], [1], [0, 0, 1, 1], [], []>} : vector<8x32xbf16>, vector<32x64xbf16>, vector<8x64xf32> -> vector<8x64xf32>
    %89 = arith.mulf %88, %88 : vector<8x64xf32>
    %90 = arith.mulf %88, %89 : vector<8x64xf32>
    %cst_37 = arith.constant 4.471500e-02 : f32
    %91 = vector.broadcast %cst_37 : f32 to vector<8x64xf32>
    %92 = arith.mulf %91, %90 : vector<8x64xf32>
    %93 = arith.addf %88, %92 : vector<8x64xf32>
    %cst_38 = arith.constant 0.797884583 : f32
    %94 = vector.broadcast %cst_38 : f32 to vector<8x64xf32>
    %95 = arith.mulf %94, %93 : vector<8x64xf32>
    %96 = math.tanh %95 : vector<8x64xf32>
    %cst_39 = arith.constant 1.000000e+00 : f32
    %97 = vector.broadcast %cst_39 : f32 to vector<8x64xf32>
    %98 = arith.addf %97, %96 : vector<8x64xf32>
    %cst_40 = arith.constant 5.000000e-01 : f32
    %99 = vector.broadcast %cst_40 : f32 to vector<8x64xf32>
    %100 = arith.mulf %99, %98 : vector<8x64xf32>
    %101 = arith.mulf %88, %100 : vector<8x64xf32>
    %102 = arith.truncf %101 : vector<8x64xf32> to vector<8x64xbf16>
    %c0_41 = arith.constant 0 : index
    %c0_42 = arith.constant 0 : index
    %103 = vector.load %arg10[%c0_41, %c0_42] : memref<64x32xbf16, #tpu.memory_space<vmem>>, vector<64x32xbf16>
    %cst_43 = arith.constant dense<0.000000e+00> : vector<8x32xf32>
    %104 = tpu.matmul %102, %103, %cst_43 {dimension_numbers = #tpu.dot_dimension_numbers<[1], [0], [0], [1], [0, 0, 1, 1], [], []>} : vector<8x64xbf16>, vector<64x32xbf16>, vector<8x32xf32> -> vector<8x32xf32>
    %105 = arith.addf %85, %104 : vector<8x32xf32>
    %106 = vector.extract_strided_slice %60 {offsets = [2, 0], sizes = [1, 32], strides = [1, 1]} : vector<4x32xf32> to vector<1x32xf32>
    %107 = vector.extract_strided_slice %60 {offsets = [3, 0], sizes = [1, 32], strides = [1, 1]} : vector<4x32xf32> to vector<1x32xf32>
    %cst_44 = arith.constant dense<0.000000e+00> : vector<8xf32>
    %108 = vector.multi_reduction <add>, %105, %cst_44 [1] : vector<8x32xf32> to vector<8xf32>
    %109 = vector.shape_cast %108 : vector<8xf32> to vector<8x1xf32>
    %cst_45 = arith.constant 3.200000e+01 : f32
    %110 = vector.broadcast %cst_45 : f32 to vector<8x1xf32>
    %111 = arith.divf %109, %110 : vector<8x1xf32>
    %112 = vector.broadcast %111 : vector<8x1xf32> to vector<8x32xf32>
    %113 = arith.subf %105, %112 : vector<8x32xf32>
    %114 = arith.mulf %113, %113 : vector<8x32xf32>
    %cst_46 = arith.constant dense<0.000000e+00> : vector<8xf32>
    %115 = vector.multi_reduction <add>, %114, %cst_46 [1] : vector<8x32xf32> to vector<8xf32>
    %116 = vector.shape_cast %115 : vector<8xf32> to vector<8x1xf32>
    %cst_47 = arith.constant 3.200000e+01 : f32
    %117 = vector.broadcast %cst_47 : f32 to vector<8x1xf32>
    %118 = arith.divf %116, %117 : vector<8x1xf32>
    %119 = vector.broadcast %111 : vector<8x1xf32> to vector<8x32xf32>
    %120 = arith.subf %105, %119 : vector<8x32xf32>
    %cst_48 = arith.constant 9.99999996E-13 : f32
    %121 = vector.broadcast %cst_48 : f32 to vector<8x1xf32>
    %122 = arith.addf %118, %121 : vector<8x1xf32>
    %123 = math.rsqrt %122 : vector<8x1xf32>
    %124 = vector.broadcast %123 : vector<8x1xf32> to vector<8x32xf32>
    %125 = arith.mulf %120, %124 : vector<8x32xf32>
    %126 = vector.broadcast %106 : vector<1x32xf32> to vector<8x32xf32>
    %127 = arith.mulf %125, %126 : vector<8x32xf32>
    %128 = vector.broadcast %107 : vector<1x32xf32> to vector<8x32xf32>
    %129 = arith.addf %127, %128 : vector<8x32xf32>
    %c0_49 = arith.constant 0 : index
    %c0_50 = arith.constant 0 : index
    %130 = vector.load %arg12[%c0_49, %c0_50] : memref<8x32xf32, #tpu.memory_space<vmem>>, vector<8x32xf32>
    tpu.vector_store %arg12[%c0_49, %c0_50], %129 {strides = array<i32>} : memref<8x32xf32, #tpu.memory_space<vmem>>, vector<8x32xf32>,
    return
  }
  func.func @transform_0(%arg0: i32) -> (i32, i32) {
    %c0_i32 = arith.constant 0 : i32
    %c0_i32_0 = arith.constant 0 : i32
    return %arg0, %c0_i32 : i32, i32
  }
  func.func @transform_1(%arg0: i32) -> (i32, i32) {
    %c0_i32 = arith.constant 0 : i32
    %c0_i32_0 = arith.constant 0 : i32
    return %arg0, %c0_i32 : i32, i32
  }
  func.func @transform_2(%arg0: i32) -> (i32, i32) {
    %c0_i32 = arith.constant 0 : i32
    %c0_i32_0 = arith.constant 0 : i32
    %c0_i32_1 = arith.constant 0 : i32
    return %c0_i32, %c0_i32_0 : i32, i32
  }
  func.func @transform_3(%arg0: i32) -> (i32, i32) {
    %c0_i32 = arith.constant 0 : i32
    %c0_i32_0 = arith.constant 0 : i32
    %c0_i32_1 = arith.constant 0 : i32
    return %c0_i32, %c0_i32_0 : i32, i32
  }
  func.func @transform_4(%arg0: i32) -> (i32, i32) {
    %c0_i32 = arith.constant 0 : i32
    %c0_i32_0 = arith.constant 0 : i32
    %c0_i32_1 = arith.constant 0 : i32
    return %c0_i32, %c0_i32_0 : i32, i32
  }
  func.func @transform_5(%arg0: i32) -> (i32, i32) {
    %c0_i32 = arith.constant 0 : i32
    %c0_i32_0 = arith.constant 0 : i32
    %c0_i32_1 = arith.constant 0 : i32
    return %c0_i32, %c0_i32_0 : i32, i32
  }
  func.func @transform_6(%arg0: i32) -> (i32, i32) {
    %c0_i32 = arith.constant 0 : i32
    %c0_i32_0 = arith.constant 0 : i32
    %c0_i32_1 = arith.constant 0 : i32
    return %c0_i32, %c0_i32_0 : i32, i32
  }
  func.func @transform_7(%arg0: i32) -> (i32, i32) {
    %c0_i32 = arith.constant 0 : i32
    %c0_i32_0 = arith.constant 0 : i32
    %c0_i32_1 = arith.constant 0 : i32
    return %c0_i32, %c0_i32_0 : i32, i32
  }
  func.func @transform_8(%arg0: i32) -> (i32, i32) {
    %c0_i32 = arith.constant 0 : i32
    %c0_i32_0 = arith.constant 0 : i32
    %c0_i32_1 = arith.constant 0 : i32
    return %c0_i32, %c0_i32_0 : i32, i32
  }
  func.func @transform_9(%arg0: i32) -> (i32, i32) {
    %c0_i32 = arith.constant 0 : i32
    %c0_i32_0 = arith.constant 0 : i32
    %c0_i32_1 = arith.constant 0 : i32
    return %c0_i32, %c0_i32_0 : i32, i32
  }
  func.func @transform_10(%arg0: i32) -> (i32, i32) {
    %c0_i32 = arith.constant 0 : i32
    %c0_i32_0 = arith.constant 0 : i32
    %c0_i32_1 = arith.constant 0 : i32
    return %c0_i32, %c0_i32_0 : i32, i32
  }
  func.func @transform_11(%arg0: i32) -> (i32, i32) {
    %c0_i32 = arith.constant 0 : i32
    %c0_i32_0 = arith.constant 0 : i32
    return %arg0, %c0_i32 : i32, i32
  }
}

</mosaic_0001>

<bundles_post_ra>
// kernel: tpu_custom_call.1
= control target key start
LH: loop header
LB: loop body
LE: loop exit
PB: predicated region body
PF: predicated region fallthrough
CT: control target
= control target key end

     0   :  { %v41_v0 = vlaneseq  ;;  %s2554_s0 = inlined_call_operand.vmem [shape: s32[8,8], index: 0, kind: input, shape index: {}]   ;;  %s2555_s1 = inlined_call_operand.vmem [shape: f32[8,8], index: 1, kind: input, shape index: {}]   ;;  %s2556_s2 = inlined_call_operand.vmem [shape: bf16[128,32], index: 2, kind: input, shape index: {}]   ;;  %s2557_s3 = inlined_call_operand.vmem [shape: f32[8,32], index: 3, kind: input, shape index: {}]   ;;  %s2558_s4 = inlined_call_operand.vmem [shape: bf16[32,32], index: 4, kind: input, shape index: {}]   ;;  %s2559_s5 = inlined_call_operand.vmem [shape: bf16[32,32], index: 5, kind: input, shape index: {}]   ;;  %s2560_s6 = inlined_call_operand.vmem [shape: bf16[32,32], index: 6, kind: input, shape index: {}]   ;;  %s2561_s7 = inlined_call_operand.vmem [shape: bf16[32,32], index: 7, kind: input, shape index: {}]   ;;  %s2562_s8 = inlined_call_operand.vmem [shape: bf16[32,64], index: 8, kind: input, shape index: {}]   ;;  %s2563_s9 = inlined_call_operand.vmem [shape: bf16[64,32], index: 9, kind: input, shape index: {}]   ;;  %s2564_s10 = inlined_call_operand.vmem [shape: f32[4,32], index: 10, kind: input, shape index: {}]   ;;  %s2565_s11 = inlined_call_operand.hbm [shape: f32[8,32], index: 11, kind: output, shape index: {}]  }
   0x1   :  { %v1984_v1 = vld [vmem:[%s2556_s2 + $0x38] sm:$0xff]   ;;  %v1985_v3 = vld [vmem:[%s2556_s2 + $0x30] sm:$0xff]   ;;  %v40_v4 = vld [vmem:[%s2554_s0] sm:$0xff] }
   0x2   :  { %v2121_v2 = vshrl.u32 %v41_v0, 7  ;;  %1892 = vmatprep.subr.bf16.mxu0 %v1984_v1  ;;  %v1986_v9 = vld [vmem:[%s2556_s2 + $0x28] sm:$0xff]   ;;  %v1987_v18 = vld [vmem:[%s2556_s2 + $0x20] sm:$0xff]   ;;  %v1988_v21 = vld [vmem:[%s2556_s2 + $0x18] sm:$0xff]  }
   0x3   :  { %1893 = vmatpush3.bf16.msra.mxu0 %v1984_v1  ;;  %v1989_v24 = vld [vmem:[%s2556_s2 + $0x10] sm:$0xff]  }
   0x4   :  { %v2130_v5 = vsub.s32 0, %v2121_v2  ;;  %v2133_v6 = vsub.s32 2, %v2121_v2  ;;  %v2136_v7 = vsub.s32 3, %v2121_v2  ;;  %v2139_v8 = vsub.s32 1, %v2121_v2  ;;  %1894 = vmatprep.subr.bf16.mxu0 %v1985_v3 }
   0x5   :  { %v2147_v12 = vsub.s32 5, %v2121_v2  ;;  %v2152_v15 = vsub.s32 4, %v2121_v2  ;;  %v2155_v16 = vsub.s32 7, %v2121_v2  ;;  %v2158_v17 = vsub.s32 6, %v2121_v2 }
   0x6   :  { %v60_v10 = vrot.slane %v40_v4, %v2133_v6  ;;  %v46_v11 = vrot.slane %v40_v4, %v2130_v5  ;;  %v67_v13 = vrot.slane %v40_v4, %v2136_v7  ;;  %v53_v14 = vrot.slane %v40_v4, %v2139_v8 }
   0x7   :  { %1895 = vmatpush3.bf16.msra.mxu0 %v1985_v3  ;;  %v81_v19 = vrot.slane %v40_v4, %v2147_v12  ;;  %v74_v20 = vrot.slane %v40_v4, %v2152_v15  ;;  %v95_v22 = vrot.slane %v40_v4, %v2155_v16  ;;  %v88_v23 = vrot.slane %v40_v4, %v2158_v17 }
   0x8   :  { %62 = vbcast.lane.b32.xlu1 %v60_v10, 256  ;;  %48 = vbcast.lane.b32.xlu0 %v46_v11, 256 }
   0x9   :  { %1896 = vmatprep.subr.bf16.mxu0 %v1986_v9 }
   0xb   :  { %1897 = vmatpush3.bf16.msra.mxu0 %v1986_v9 }
   0xc   :  { %69 = vbcast.lane.b32.xlu1 %v67_v13, 256  ;;  %55 = vbcast.lane.b32.xlu0 %v53_v14, 256 }
   0xd   :  { %1898 = vmatprep.subr.bf16.mxu0 %v1987_v18 }
   0xf   :  { %1899 = vmatpush3.bf16.msra.mxu0 %v1987_v18 }
  0x10   :  { %83 = vbcast.lane.b32.xlu1 %v81_v19, 256  ;;  %76 = vbcast.lane.b32.xlu0 %v74_v20, 256 }
  0x11   :  { %1900 = vmatprep.subr.bf16.mxu0 %v1988_v21 }
  0x14   :  { %97 = vbcast.lane.b32.xlu1 %v95_v22, 256  ;;  %90 = vbcast.lane.b32.xlu0 %v88_v23, 256 }
  0x15   :  { %16 = vsyncpa [#allocation3], 0  ;;  %1901 = vmatpush3.bf16.msra.mxu0 %v1988_v21  ;;  %v1990_v25 = vld [vmem:[%s2556_s2 + $0x8] sm:$0xff]   ;;  %v1991_v26 = vld [vmem:[%s2556_s2] sm:$0xff]   ;;  %v2179_v29 = vand.u32 127, %v41_v0  ;;  %v2053_v40 = vmov 0.0  }
  0x16   :  { %1902 = vmatprep.subr.bf16.mxu0 %v1989_v24  ;;  %v2052_v32 = vmov 1.0|1.0   ;;  %v1992_v37 = vld [vmem:[%s2559_s5 + $0x8] sm:$0xff]   ;;  %v1993_v38 = vld [vmem:[%s2559_s5] sm:$0xff]   ;;  %vm2054_vm12 = vmmov 0   ;;  %vm338_vm13 = vcmask 261120  }
  0x17   :  { %1916 = vmatprep.subr.bf16.mxu1 %v1992_v37  ;;  %v1994_v39 = vld [vmem:[%s2560_s6 + $0x8] sm:$0xff]   ;;  %v293_v41 = vld [vmem:[%s2555_s1] sm:$0xff]  ;;  %vm502_vm14 = vcmask 1041409   ;;  %vm505_vm15 = vcmask 1042434  }
  0x18   :  { %1917 = vmatpush3.bf16.msra.mxu1 %v1992_v37  ;;  %v708_v42 = vsub.f32 1.0, %v293_v41  ;;  %v284_v49 = vld [vmem:[%s2557_s3] sm:$0xff] }
  0x19   :  { %1903 = vmatpush3.bf16.msra.mxu0 %v1989_v24  ;;  %1918 = vmatprep.subr.bf16.mxu1 %v1993_v38  ;;  %v1995_v59 = vld [vmem:[%s2560_s6] sm:$0xff]  }
  0x1a   :  { %1904 = vmatprep.subr.bf16.mxu0 %v1990_v25  ;;  %v2204_v43 = vmul.f32 -1e+09, %v708_v42  ;;  %v1997_v37 = vld [vmem:[%s2558_s4] sm:$0xff]  }
  0x1c   :  { %1919 = vmatpush3.bf16.msra.mxu1 %v1993_v38  ;;  %v714_v44 = vrot.slane %v2204_v43, %v2130_v5  ;;  %v728_v45 = vrot.slane %v2204_v43, %v2133_v6 }
  0x1d   :  { %1905 = vmatpush3.bf16.msra.mxu0 %v1990_v25  ;;  %1928 = vmatprep.subr.bf16.mxu1 %v1994_v39 }
  0x1e   :  { %1906 = vmatprep.subr.bf16.mxu0 %v1991_v26  ;;  %716 = vbcast.lane.b32.xlu1 %v714_v44, 256 }
  0x21   :  { %1907 = vmatpush3.bf16.msra.mxu0 %v1991_v26 }
  0x22   :  { %1964 = vmatprep.subr.bf16.mxu0 %v2053_v40  ;;  %730 = vbcast.lane.b32.xlu1 %v728_v45, 256 }
  0x7a   :  { %v63_v27 = vpop.permute.xlu1 %62  ;;  %v49_v28 = vpop.permute.xlu0 %48 }
  0x7b   :  { %vm101_vm0 = vcmp.eq.s32.totalorder %v63_v27, %v2179_v29  ;;  %vm99_vm3 = vcmp.eq.s32.totalorder %v49_v28, %v2179_v29  ;;  %v1996_v28 = vld [vmem:[%s2558_s4 + $0x8] sm:$0xff]  }
  0x7e   :  { %v70_v30 = vpop.permute.xlu1 %69  ;;  %v56_v31 = vpop.permute.xlu0 %55 }
  0x7f   :  { %vm102_vm1 = vcmp.eq.s32.totalorder %v70_v30, %v2179_v29  ;;  %vm100_vm2 = vcmp.eq.s32.totalorder %v56_v31, %v2179_v29 }
  0x80   :  { %vm1844_vm4 = vmpackc.low %vm102_vm1, %vm101_vm0  ;;  %vm508_vm0 = vcmask 1043459   ;;  %vm511_vm1 = vcmask 1044484  }
  0x81   :  { %vm1842_vm5 = vmpackc.low %vm100_vm2, %vm99_vm3  ;;  %vm514_vm2 = vcmask 1045509   ;;  %vm517_vm3 = vcmask 1046534  }
  0x82   :  { %1908 = vmatprep.mubr.msk.bf16.mxu0 %vm1842_vm5, %v2052_v32  ;;  %v84_v33 = vpop.permute.xlu1 %83  ;;  %v77_v34 = vpop.permute.xlu0 %76  ;;  %vm855_vm5 = vcmask 64512  }
  0x83   :  { %1909 = vmatmul.mubr.msk.bf16.vlgmr.msra.gmra.mxu0 %vm1844_vm4, %v2052_v32  ;;  %vm104_vm6 = vcmp.eq.s32.totalorder %v84_v33, %v2179_v29  ;;  %vm103_vm7 = vcmp.eq.s32.totalorder %v77_v34, %v2179_v29  ;;  %vm520_vm4 = vcmask 1047559  }
  0x84   :  { %vm1846_vm8 = vmpackc.low %vm104_vm6, %vm103_vm7  ;;  %vm1546_vm6 = vcmask 523264  }
  0x85   :  { %1912 = vmatprep.mubr.msk.bf16.mxu0 %vm1846_vm8, %v2052_v32 }
  0x86   :  { %v98_v35 = vpop.permute.xlu1 %97  ;;  %v91_v36 = vpop.permute.xlu0 %90 }
  0x87   :  { %vm106_vm9 = vcmp.eq.s32.totalorder %v98_v35, %v2179_v29  ;;  %vm105_vm10 = vcmp.eq.s32.totalorder %v91_v36, %v2179_v29 }
  0x88   :  { %vm1848_vm11 = vmpackc.low %vm106_vm9, %vm105_vm10 }
  0x8b   :  { %1913 = vmatmul.mubr.msk.bf16.gmra.mxu0 %vm1848_vm11, %v2052_v32 }
  0x8c   :  { %1972 = vmatprep.mubr.msk.bf16.mxu0 %vm2054_vm12, %v2053_v40 }
 0x143   :  { %v1910_v46 = vpop.f32.mrf.mxu0 }
 0x144   :  { %v2219_v55 = vadd.f32 %v1910_v46, %v284_v49 }
 0x145   :  { %v253_v47 = vpop.f32.mrf.mxu0 }
 0x146   :  { %v2215_v52 = vadd.f32 %v284_v49, %v253_v47  ;;  %v296_v4 = vpack.c.bf16 %v2219_v55, %v2219_v55 }
 0x147   :  { %v1911_v48 = vpop.f32.mrf.mxu0 }
 0x148   :  { %v2213_v51 = vadd.f32 %v1911_v48, %v284_v49  ;;  %v294_v10 = vpack.c.bf16 %v2215_v52, %v2215_v52  ;;  %v316_v19 = vunpack.c.l.b16 %v296_v4 }
 0x149   :  { %v256_v50 = vpop.f32.mrf.mxu0 }
 0x14a   :  { %v2217_v53 = vadd.f32 %v284_v49, %v256_v50  ;;  %v1851_v58 = vpack.c.bf16 %v2213_v51, %v2219_v55  ;;  %v297_v14 = vpack.c.bf16 %v2213_v51, %v2213_v51  ;;  %v314_v21 = vunpack.c.l.b16 %v294_v10 }
 0x14b   :  { %v1914_v54 = vpop.f32.mrf.mxu0  ;;  %v504_v25 = vrot.slane %v316_v19, 6  ;;  %v721_v50 = vrot.slane %v2204_v43, %v2139_v8 }
 0x14c   :  { %v1850_v57 = vpack.c.bf16 %v2217_v53, %v2215_v52  ;;  %v295_v60 = vpack.c.bf16 %v2217_v53, %v2217_v53  ;;  %v2240_v9 = vadd.f32 %v1914_v54, %v284_v49  ;;  %v317_v23 = vunpack.c.l.b16 %v297_v14 }
 0x14d   :  { %v269_v56 = vpop.f32.mrf.mxu0  ;;  %v749_v54 = vrot.slane %v2204_v43, %v2147_v12  ;;  %723 = vbcast.lane.b32.xlu0 %v721_v50, 256  ;;  %v2055_v14 = vmov 1966171168  }
 0x14e   :  { %1920 = vmatprep.mubr.msk.bf16.mxu1 %vm338_vm13, %v1850_v57  ;;  %v315_v0 = vunpack.c.l.b16 %v295_v60  ;;  %v2234_v1 = vadd.f32 %v284_v49, %v269_v56  ;;  %v300_v31 = vpack.c.bf16 %v2240_v9, %v2240_v9  ;;  %v507_v32 = vrot.slane %v317_v23, 5 }
 0x14f   :  { %v1915_v61 = vpop.f32.mrf.mxu0  ;;  %1921 = vmatmul.mubr.msk.bf16.vlgmr.msra.gmra.mxu1 %vm338_vm13, %v1851_v58  ;;  %v742_v56 = vrot.slane %v2204_v43, %v2152_v15 }
 0x150   :  { %1929 = vmatpush3.bf16.msra.mxu1 %v1994_v39  ;;  %v2232_v63 = vadd.f32 %v1915_v61, %v284_v49  ;;  %v501_v18 = vrot.slane %v315_v0, 7  ;;  %v298_v20 = vpack.c.bf16 %v2234_v1, %v2234_v1  ;;  %v320_v38 = vunpack.c.l.b16 %v300_v31 }
 0x151   :  { %v272_v62 = vpop.f32.mrf.mxu0  ;;  %1930 = vmatprep.subr.bf16.mxu1 %v1995_v59  ;;  %744 = vbcast.lane.b32.xlu0 %v742_v56, 256 }
 0x152   :  { %v2236_v3 = vadd.f32 %v284_v49, %v272_v62  ;;  %v1853_v13 = vpack.c.bf16 %v2232_v63, %v2240_v9  ;;  %v503_v24 = vsel %vm502_vm14, %v501_v18, %v314_v21  ;;  %v318_v26 = vunpack.c.l.b16 %v298_v20 }
 0x153   :  { %v506_v30 = vsel %vm505_vm15, %v504_v25, %v503_v24  ;;  %v301_v35 = vpack.c.bf16 %v2232_v63, %v2232_v63  ;;  %v516_v44 = vrot.slane %v320_v38, 2  ;;  %v735_v49 = vrot.slane %v2204_v43, %v2136_v7 }
 0x154   :  { %v1852_v11 = vpack.c.bf16 %v2236_v3, %v2234_v1  ;;  %1931 = vmatpush3.bf16.msra.mxu1 %v1995_v59  ;;  %v299_v22 = vpack.c.bf16 %v2236_v3, %v2236_v3  ;;  %v510_v33 = vrot.slane %v318_v26, 4  ;;  %v509_v34 = vsel %vm508_vm0, %v507_v32, %v506_v30 }
 0x155   :  { %1940 = vmatprep.subr.bf16.mxu1 %v2053_v40  ;;  %v321_v41 = vunpack.c.l.b16 %v301_v35  ;;  %737 = vbcast.lane.b32.xlu1 %v735_v49, 256  ;;  %v581_v18 = vunpack.c.l.s4 %v2055_v14 }
 0x156   :  { %1924 = vmatprep.mubr.msk.bf16.mxu1 %vm338_vm13, %v1852_v11  ;;  %v319_v27 = vunpack.c.l.b16 %v299_v22  ;;  %v512_v39 = vsel %vm511_vm1, %v510_v33, %v509_v34 }
 0x157   :  { %1925 = vmatmul.mubr.msk.bf16.gmra.mxu1 %vm338_vm13, %v1853_v13  ;;  %v519_v46 = vrot.slane %v321_v41, 1  ;;  %v582_v21 = vunpack.c.0.s8 %v581_v18 }
 0x158   :  { %1932 = vmatprep.mubr.msk.bf16.mxu1 %vm338_vm13, %v1850_v57  ;;  %v513_v36 = vrot.slane %v319_v27, 3 }
 0x159   :  { %751 = vbcast.lane.b32.xlu1 %v749_v54, 256  ;;  %v585_v24 = vsub.s32 %v582_v21, %v2121_v2 }
 0x15a   :  { %v515_v42 = vsel %vm514_vm2, %v513_v36, %v512_v39 }
 0x15b   :  { %v518_v45 = vsel %vm517_vm3, %v516_v44, %v515_v42 }
 0x15c   :  { %v521_v47 = vsel %vm520_vm4, %v519_v46, %v518_v45 }
 0x15d   :  { %v522_v48 = vpack.c.b16 %v521_v47, %v521_v47 }
 0x15f   :  { %1933 = vmatmul.mubr.msk.bf16.vlgmr.msra.gmra.mxu1 %vm338_vm13, %v1851_v58 }
 0x160   :  { %1941 = vmatpush3.bf16.msra.mxu1 %v1996_v28  ;;  %1936 = vmatprep.mubr.msk.bf16.mxu1 %vm338_vm13, %v1852_v11 }
 0x161   :  { %1942 = vmatprep.subr.bf16.mxu1 %v2053_v40 }
 0x164   :  { %1943 = vmatpush3.bf16.msra.mxu1 %v1997_v37 }
 0x165   :  { %1948 = vmatprep.subr.bf16.mxu1 %v2053_v40 }
 0x167   :  { %1937 = vmatmul.mubr.msk.bf16.gmra.mxu1 %vm338_vm13, %v1853_v13 }
 0x168   :  { %1944 = vmatprep.mubr.msk.bf16.mxu1 %vm2054_vm12, %v2053_v40 }
 0x16f   :  { %1945 = vmatmul.mubr.msk.bf16.vlgmr.msra.gmra.mxu1 %vm338_vm13, %v522_v48 }
 0x170   :  { %1952 = vmatprep.mubr.msk.bf16.mxu1 %vm2054_vm12, %v2053_v40 }
 0x20f   :  { %v1922_v57 = vpop.f32.mrf.mxu1 }
 0x211   :  { %v385_v58 = vpop.f32.mrf.mxu1 }
 0x213   :  { %v1923_v59 = vpop.f32.mrf.mxu1 }
 0x215   :  { %v388_v60 = vpop.f32.mrf.mxu1 }
 0x217   :  { %v1926_v61 = vpop.f32.mrf.mxu1 }
 0x219   :  { %v401_v62 = vpop.f32.mrf.mxu1 }
 0x21b   :  { %v1927_v0 = vpop.f32.mrf.mxu1 }
 0x21d   :  { %v404_v4 = vpop.f32.mrf.mxu1 }
 0x21f   :  { %v2293_v10 = vpop.f32.mrf.mxu1 }
 0x221   :  { %v2295_v11 = vpop.f32.mrf.mxu1 }
 0x223   :  { %v2297_v13 = vpop.f32.mrf.mxu1 }
 0x225   :  { %v2299_v19 = vpop.f32.mrf.mxu1 }
 0x227   :  { %v2301_v20 = vpop.f32.mrf.mxu1 }
 0x229   :  { %v2303_v22 = vpop.f32.mrf.mxu1 }
 0x22b   :  { %v2305_v23 = vpop.f32.mrf.mxu1 }
 0x22d   :  { %v2308_v25 = vpop.f32.mrf.mxu1 }
 0x22f   :  { %v572_v26 = vpop.f32.mrf.mxu1 }
 0x230   :  { %v579_v27 = vcombine.high %v572_v26, %v572_v26  ;;  %v586_v28 = vrot.slane %v572_v26, %v585_v24 }
 0x231   :  { %v1946_v30 = vpop.f32.mrf.mxu1 }
 0x232   :  { %v593_v31 = vrot.slane %v579_v27, %v585_v24  ;;  %v594_v32 = vcombine.high %v586_v28, %v586_v28  ;;  %v602_v33 = vrot.slane %v586_v28, %v585_v24 }
 0x233   :  { %v575_v34 = vpop.f32.mrf.mxu1 }
 0x234   :  { %v609_v35 = vrot.slane %v593_v31, %v585_v24  ;;  %v616_v36 = vrot.slane %v594_v32, %v585_v24  ;;  %v624_v37 = vcombine.high %v602_v33, %v602_v33  ;;  %v595_v38 = vcombine.high %v593_v31, %v593_v31 }
 0x235   :  { %v1947_v39 = vpop.f32.mrf.mxu1  ;;  %v631_v41 = vrot.slane %v602_v33, %v2130_v5  ;;  %v2056_v34 = vmov 0  }
 0x236   :  { %v635_v42 = vrot.slane %v616_v36, %v2130_v5  ;;  %v639_v44 = vrot.slane %v624_v37, %v2130_v5  ;;  %v647_v45 = vrot.slane %v609_v35, %v2130_v5  ;;  %v626_v46 = vcombine.high %v616_v36, %v616_v36  ;;  %1982 = vset.pattern.permute.xlu0 %v2056_v34  ;;  %v717_v36 = vpop.permute.xlu1 %716 }
 0x237   :  { %v668_v47 = vmul.f32 %v631_v41, %v385_v58  ;;  %v625_v48 = vcombine.high %v609_v35, %v609_v35  ;;  %v623_v14 = vrot.slane %v595_v38, %v585_v24  ;;  %1983 = vset.pattern.permute.xlu1 %v2056_v34  ;;  %v724_v38 = vpop.permute.xlu0 %723  ;;  %v2335_v34 = vsub.s32 %v2179_v29, %v2121_v2 }
 0x238   :  { %v669_v49 = vmul.f32 %v635_v42, %v388_v60  ;;  %v670_v54 = vmul.f32 %v1922_v57, %v639_v44  ;;  %v643_v56 = vrot.slane %v626_v46, %v2130_v5  ;;  %v672_v21 = vmul.f32 %v647_v45, %v401_v62 }
 0x239   :  { %v676_v50 = vsel %vm338_vm13, %v668_v47, 0.0  ;;  %v655_v26 = vrot.slane %v625_v48, %v2130_v5  ;;  %v651_v58 = vrot.slane %v623_v14, %v2130_v5  ;;  %v627_v30 = vcombine.high %v623_v14, %v623_v14 }
 0x23a   :  { %677 = vadd.xlane.f32.xlu0 %v676_v50  ;;  %v679_v18 = vsel %vm338_vm13, %v669_v49, 0.0  ;;  %v682_v27 = vsel %vm338_vm13, %v670_v54, 0.0  ;;  %v671_v28 = vmul.f32 %v1923_v59, %v643_v56  ;;  %v688_v60 = vsel %vm338_vm13, %v672_v21, 0.0  ;;  %v731_v37 = vpop.permute.xlu1 %730 }
 0x23b   :  { %680 = vadd.xlane.f32.xlu1 %v679_v18  ;;  %v674_v57 = vmul.f32 %v1926_v61, %v655_v26  ;;  %v673_v31 = vmul.f32 %v651_v58, %v404_v4  ;;  %v659_v32 = vrot.slane %v627_v30, %v2130_v5  ;;  %v763_v61 = vrot.slane %v2204_v43, %v2155_v16 }
 0x23c   :  { %v685_v24 = vsel %vm338_vm13, %v671_v28, 0.0  ;;  %v756_v4 = vrot.slane %v2204_v43, %v2158_v17 }
 0x23d   :  { %v694_v62 = vsel %vm338_vm13, %v674_v57, 0.0  ;;  %v691_v33 = vsel %vm338_vm13, %v673_v31, 0.0  ;;  %v675_v59 = vmul.f32 %v1927_v0, %v659_v32  ;;  %v745_v0 = vpop.permute.xlu0 %744 }
 0x23e   :  { %683 = vadd.xlane.f32.xlu0 %v682_v27  ;;  %v738_v39 = vpop.permute.xlu1 %737 }
 0x23f   :  { %689 = vadd.xlane.f32.xlu1 %v688_v60  ;;  %v697_v35 = vsel %vm338_vm13, %v675_v59, 0.0 }
 0x242   :  { %686 = vadd.xlane.f32.xlu0 %v685_v24  ;;  %v752_v41 = vpop.permute.xlu1 %751 }
 0x243   :  { %695 = vadd.xlane.f32.xlu1 %v694_v62 }
 0x246   :  { %692 = vadd.xlane.f32.xlu0 %v691_v33 }
 0x24a   :  { %698 = vadd.xlane.f32.xlu0 %v697_v35 }
 0x254   :  { %765 = vbcast.lane.b32.xlu1 %v763_v61, 256 }
 0x260   :  { %758 = vbcast.lane.b32.xlu0 %v756_v4, 256 }
 0x2c3   :  { %v678_v42 = vpop.xlane.xlu0 %677 }
 0x2c4   :  { %v700_v44 = vmul.f32 0.17677669, %v678_v42  ;;  %v681_v45 = vpop.xlane.xlu1 %680 }
 0x2c5   :  { %v701_v46 = vmul.f32 0.17677669, %v681_v45 }
 0x2c6   :  { %v775_v47 = vadd.f32 %v717_v36, %v700_v44 }
 0x2c7   :  { %v776_v48 = vadd.f32 %v724_v38, %v701_v46  ;;  %v684_v49 = vpop.xlane.xlu0 %683 }
 0x2c8   :  { %v702_v50 = vmul.f32 0.17677669, %v684_v49  ;;  %792 = vperm.xlu0 %1982, %v775_v47   ;;  %v690_v54 = vpop.xlane.xlu1 %689 }
 0x2c9   :  { %795 = vperm.xlu1 %1983, %v776_v48   ;;  %v704_v43 = vmul.f32 0.17677669, %v690_v54 }
 0x2ca   :  { %v777_v56 = vadd.f32 %v731_v37, %v702_v50 }
 0x2cb   :  { %v687_v14 = vpop.xlane.xlu0 %686  ;;  %v779_v26 = vadd.f32 %v745_v0, %v704_v43 }
 0x2cc   :  { %v703_v18 = vmul.f32 0.17677669, %v687_v14  ;;  %v696_v27 = vpop.xlane.xlu1 %695 }
 0x2cd   :  { %798 = vperm.xlu1 %1983, %v777_v56   ;;  %v706_v31 = vmul.f32 0.17677669, %v696_v27 }
 0x2ce   :  { %v778_v21 = vadd.f32 %v738_v39, %v703_v18 }
 0x2cf   :  { %v693_v28 = vpop.xlane.xlu0 %692 }
 0x2d0   :  { %v705_v58 = vmul.f32 0.17677669, %v693_v28  ;;  %801 = vperm.xlu0 %1982, %v778_v21   ;;  %v766_v57 = vpop.permute.xlu1 %765 }
 0x2d1   :  { %804 = vperm.xlu1 %1983, %v779_v26  }
 0x2d2   :  { %v780_v30 = vadd.f32 %v752_v41, %v705_v58 }
 0x2d3   :  { %v699_v60 = vpop.xlane.xlu0 %698 }
 0x2d4   :  { %v707_v24 = vmul.f32 0.17677669, %v699_v60  ;;  %807 = vperm.xlu0 %1982, %v780_v30  }
 0x2d6   :  { %v2330_v32 = vadd.f32 %v766_v57, %v707_v24 }
 0x2d7   :  { %v759_v62 = vpop.permute.xlu0 %758 }
 0x2d8   :  { %v781_v33 = vadd.f32 %v759_v62, %v706_v31  ;;  %813 = vperm.xlu0 %1982, %v2330_v32  }
 0x2da   :  { %810 = vperm.xlu1 %1983, %v781_v33  }
 0x343   :  { %v793_v35 = vpop.permute.xlu0 %792 }
 0x344   :  { %v796_v59 = vpop.permute.xlu1 %795  ;;  %v818_v37 = vrot.slane %v793_v35, %v2335_v34 }
 0x345   :  { %v822_v4 = vrot.slane %v796_v59, %v2335_v34 }
 0x347   :  { %v847_v39 = vsel %vm502_vm14, %v822_v4, %v818_v37 }
 0x348   :  { %v799_v61 = vpop.permute.xlu1 %798 }
 0x349   :  { %v826_v36 = vrot.slane %v799_v61, %v2335_v34 }
 0x34b   :  { %v802_v38 = vpop.permute.xlu0 %801  ;;  %v848_v42 = vsel %vm505_vm15, %v826_v36, %v847_v39 }
 0x34c   :  { %v830_v0 = vrot.slane %v802_v38, %v2335_v34  ;;  %v805_v41 = vpop.permute.xlu1 %804 }
 0x34d   :  { %v834_v2 = vrot.slane %v805_v41, %v2335_v34 }
 0x34e   :  { %v849_v29 = vsel %vm508_vm0, %v830_v0, %v848_v42 }
 0x34f   :  { %v808_v44 = vpop.permute.xlu0 %807  ;;  %v850_v46 = vsel %vm511_vm1, %v834_v2, %v849_v29 }
 0x350   :  { %v838_v45 = vrot.slane %v808_v44, %v2335_v34 }
 0x352   :  { %v851_v43 = vsel %vm514_vm2, %v838_v45, %v850_v46 }
 0x353   :  { %v814_v49 = vpop.permute.xlu0 %813 }
 0x354   :  { %v846_v14 = vrot.slane %v814_v49, %v2335_v34 }
 0x355   :  { %v811_v50 = vpop.permute.xlu1 %810 }
 0x356   :  { %v842_v54 = vrot.slane %v811_v50, %v2335_v34 }
 0x358   :  { %v852_v18 = vsel %vm517_vm3, %v842_v54, %v851_v43 }
 0x359   :  { %v853_v27 = vsel %vm520_vm4, %v846_v14, %v852_v18 }
 0x35a   :  { %v856_v28 = vsel %vm855_vm5, %v853_v27, -inf }
 0x35b   :  { %857 = vmax.xlane.f32.xlu1 %v856_v28 }
 0x3e4   :  { %v858_v58 = vpop.xlane.xlu1 %857 }
 0x3e5   :  { %v863_v60 = vrot.slane %v858_v58, %v2130_v5  ;;  %v867_v57 = vrot.slane %v858_v58, %v2139_v8  ;;  %v871_v24 = vrot.slane %v858_v58, %v2133_v6  ;;  %v875_v35 = vrot.slane %v858_v58, %v2136_v7 }
 0x3e6   :  { %v879_v36 = vrot.slane %v858_v58, %v2152_v15  ;;  %v883_v39 = vrot.slane %v858_v58, %v2147_v12  ;;  %v887_v42 = vrot.slane %v858_v58, %v2158_v17 }
 0x3e7   :  { %v900_v31 = vsub.f32 %v775_v47, %v863_v60  ;;  %v901_v62 = vsub.f32 %v776_v48, %v867_v57  ;;  %v902_v61 = vsub.f32 %v777_v56, %v871_v24  ;;  %v903_v37 = vsub.f32 %v778_v21, %v875_v35 }
 0x3e8   :  { %v904_v0 = vsub.f32 %v779_v26, %v879_v36  ;;  %v905_v47 = vsub.f32 %v780_v30, %v883_v39  ;;  %v891_v56 = vrot.slane %v858_v58, %v2155_v16  ;;  %v906_v2 = vsub.f32 %v781_v33, %v887_v42 }
 0x3e9   :  { %v908_v59 = vmul.f32 1.442695, %v900_v31  ;;  %v910_v4 = vmul.f32 1.442695, %v901_v62  ;;  %v912_v38 = vmul.f32 1.442695, %v902_v61 }
 0x3ea   :  { %v914_v41 = vmul.f32 1.442695, %v903_v37  ;;  %v916_v48 = vmul.f32 1.442695, %v904_v0  ;;  %v918_v29 = vmul.f32 1.442695, %v905_v47  ;;  %v907_v45 = vsub.f32 %v2330_v32, %v891_v56 }
 0x3eb   :  { %2006 = vpow2.f32 %v908_v59  ;;  %v920_v26 = vmul.f32 1.442695, %v906_v2 }
 0x3ec   :  { %2008 = vpow2.f32 %v910_v4  ;;  %v922_v49 = vmul.f32 1.442695, %v907_v45 }
 0x3ed   :  { %2010 = vpow2.f32 %v912_v38 }
 0x3ee   :  { %2012 = vpow2.f32 %v914_v41 }
 0x3ef   :  { %2014 = vpow2.f32 %v916_v48 }
 0x3f0   :  { %2016 = vpow2.f32 %v918_v29 }
 0x3f1   :  { %2018 = vpow2.f32 %v920_v26 }
 0x3f2   :  { %2020 = vpow2.f32 %v922_v49 }
 0x3f8   :  { %v2007_v44 = vpop.eup %2006 }
 0x3f9   :  { %933 = vperm.xlu0 %1982, %v2007_v44   ;;  %v2009_v21 = vpop.eup %2008 }
 0x3fa   :  { %v2011_v46 = vpop.eup %2010 }
 0x3fb   :  { %v2013_v30 = vpop.eup %2012 }
 0x3fc   :  { %v2015_v50 = vpop.eup %2014 }
 0x3fd   :  { %936 = vperm.xlu0 %1982, %v2009_v21   ;;  %v2017_v54 = vpop.eup %2016 }
 0x3fe   :  { %v2019_v33 = vpop.eup %2018 }
 0x3ff   :  { %v2021_v43 = vpop.eup %2020 }
 0x401   :  { %939 = vperm.xlu0 %1982, %v2011_v46  }
 0x405   :  { %942 = vperm.xlu0 %1982, %v2013_v30  }
 0x409   :  { %945 = vperm.xlu0 %1982, %v2015_v50  }
 0x40d   :  { %948 = vperm.xlu0 %1982, %v2017_v54  }
 0x411   :  { %951 = vperm.xlu0 %1982, %v2019_v33  }
 0x415   :  { %954 = vperm.xlu0 %1982, %v2021_v43  }
 0x474   :  { %v934_v14 = vpop.permute.xlu0 %933 }
 0x475   :  { %v959_v24 = vrot.slane %v934_v14, %v2335_v34 }
 0x478   :  { %v937_v18 = vpop.permute.xlu0 %936 }
 0x479   :  { %v963_v60 = vrot.slane %v937_v18, %v2335_v34 }
 0x47b   :  { %v988_v35 = vsel %vm502_vm14, %v963_v60, %v959_v24 }
 0x47c   :  { %v940_v32 = vpop.permute.xlu0 %939 }
 0x47d   :  { %v967_v57 = vrot.slane %v940_v32, %v2335_v34 }
 0x47f   :  { %v989_v4 = vsel %vm505_vm15, %v967_v57, %v988_v35 }
 0x480   :  { %v943_v27 = vpop.permute.xlu0 %942 }
 0x481   :  { %v971_v31 = vrot.slane %v943_v27, %v2335_v34 }
 0x483   :  { %v990_v37 = vsel %vm508_vm0, %v971_v31, %v989_v4 }
 0x484   :  { %v946_v28 = vpop.permute.xlu0 %945 }
 0x485   :  { %v975_v62 = vrot.slane %v946_v28, %v2335_v34 }
 0x487   :  { %v991_v38 = vsel %vm511_vm1, %v975_v62, %v990_v37 }
 0x488   :  { %v949_v58 = vpop.permute.xlu0 %948 }
 0x489   :  { %v979_v61 = vrot.slane %v949_v58, %v2335_v34 }
 0x48b   :  { %v992_v0 = vsel %vm514_vm2, %v979_v61, %v991_v38 }
 0x48c   :  { %v952_v59 = vpop.permute.xlu0 %951 }
 0x48d   :  { %v983_v36 = vrot.slane %v952_v59, %v2335_v34 }
 0x48f   :  { %v993_v42 = vsel %vm517_vm3, %v983_v36, %v992_v0 }
 0x490   :  { %v955_v39 = vpop.permute.xlu0 %954 }
 0x491   :  { %v987_v41 = vrot.slane %v955_v39, %v2335_v34 }
 0x493   :  { %v994_v47 = vsel %vm520_vm4, %v987_v41, %v993_v42 }
 0x494   :  { %v996_v48 = vsel %vm855_vm5, %v994_v47, 0.0 }
 0x495   :  { %997 = vadd.xlane.f32.xlu0 %v996_v48 }
 0x51e   :  { %v998_v56 = vpop.xlane.xlu0 %997 }
 0x51f   :  { %2022 = vrcp.f32 %v998_v56 }
 0x52c   :  { %v2023_v2 = vpop.eup %2022 }
 0x52d   :  { %v1024_v29 = vrot.slane %v2023_v2, %v2147_v12  ;;  %v1004_v45 = vrot.slane %v2023_v2, %v2130_v5  ;;  %v1008_v14 = vrot.slane %v2023_v2, %v2139_v8  ;;  %v1012_v18 = vrot.slane %v2023_v2, %v2133_v6 }
 0x52e   :  { %v1016_v27 = vrot.slane %v2023_v2, %v2136_v7  ;;  %v1020_v58 = vrot.slane %v2023_v2, %v2152_v15  ;;  %v1032_v60 = vrot.slane %v2023_v2, %v2155_v16  ;;  %v1999_v15 = vld [vmem:[%s2561_s7] sm:$0xff]  }
 0x52f   :  { %v1046_v26 = vmul.f32 %v2017_v54, %v1024_v29  ;;  %v1041_v49 = vmul.f32 %v2007_v44, %v1004_v45  ;;  %v1042_v34 = vmul.f32 %v2009_v21, %v1008_v14  ;;  %v1043_v32 = vmul.f32 %v2011_v46, %v1012_v18  ;;  %v1998_v46 = vld [vmem:[%s2561_s7 + $0x8] sm:$0xff]  }
 0x530   :  { %v1044_v28 = vmul.f32 %v2013_v30, %v1016_v27  ;;  %v1045_v12 = vmul.f32 %v2015_v50, %v1020_v58  ;;  %v1028_v54 = vrot.slane %v2023_v2, %v2158_v17  ;;  %v1048_v21 = vmul.f32 %v2021_v43, %v1032_v60  ;;  %1949 = vmatpush3.bf16.msra.mxu1 %v1998_v46 }
 0x531   :  { %1076 = vperm.xlu0 %1982, %v1046_v26   ;;  %1051 = vperm.xlu1 %1983, %v1041_v49  }
 0x532   :  { %v1047_v44 = vmul.f32 %v2019_v33, %v1028_v54  ;;  %1950 = vmatprep.subr.bf16.mxu1 %v2053_v40 }
 0x534   :  { %1951 = vmatpush3.bf16.msra.mxu1 %v1999_v15 }
 0x535   :  { %1056 = vperm.xlu1 %1983, %v1042_v34   ;;  %1956 = vmatprep.subr.bf16.mxu1 %v2053_v40 }
 0x539   :  { %1061 = vperm.xlu1 %1983, %v1043_v32  }
 0x53d   :  { %1066 = vperm.xlu1 %1983, %v1044_v28  }
 0x541   :  { %1071 = vperm.xlu1 %1983, %v1045_v12  }
 0x545   :  { %1081 = vperm.xlu1 %1983, %v1047_v44  }
 0x549   :  { %1086 = vperm.xlu1 %1983, %v1048_v21  }
 0x5ac   :  { %v1052_v17 = vpop.permute.xlu1 %1051  ;;  %v1077_v30 = vpop.permute.xlu0 %1076 }
 0x5ad   :  { %v1089_v16 = vmul.f32 %v1052_v17, %v2295_v11  ;;  %v1094_v33 = vmul.f32 %v1077_v30, %v2308_v25 }
 0x5af   :  { %v1097_v50 = vsel %vm338_vm13, %v1089_v16, 0.0  ;;  %v1132_v62 = vsel %vm338_vm13, %v1094_v33, 0.0 }
 0x5b0   :  { %v1057_v43 = vpop.permute.xlu1 %1056  ;;  %v1098_v57 = vrot.slane %v1097_v50, 4  ;;  %v1133_v37 = vrot.slane %v1132_v62, 4 }
 0x5b1   :  { %v1090_v24 = vmul.f32 %v1057_v43, %v2299_v19 }
 0x5b2   :  { %v1099_v61 = vadd.f32 %v1098_v57, %v1097_v50  ;;  %v1134_v42 = vadd.f32 %v1133_v37, %v1132_v62 }
 0x5b3   :  { %v1104_v31 = vsel %vm338_vm13, %v1090_v24, 0.0 }
 0x5b4   :  { %v1105_v59 = vrot.slane %v1104_v31, 4  ;;  %v1062_v35 = vpop.permute.xlu1 %1061  ;;  %v1100_v0 = vrot.slane %v1099_v61, 2  ;;  %v1135_v49 = vrot.slane %v1134_v42, 2 }
 0x5b5   :  { %v1091_v4 = vmul.f32 %v2293_v10, %v1062_v35 }
 0x5b6   :  { %v1106_v36 = vadd.f32 %v1105_v59, %v1104_v31  ;;  %v1101_v29 = vadd.f32 %v1100_v0, %v1099_v61  ;;  %v1136_v44 = vadd.f32 %v1135_v49, %v1134_v42 }
 0x5b7   :  { %v1111_v11 = vsel %vm338_vm13, %v1091_v4, 0.0 }
 0x5b8   :  { %v1107_v38 = vrot.slane %v1106_v36, 2  ;;  %v1112_v39 = vrot.slane %v1111_v11, 4  ;;  %v1067_v25 = vpop.permute.xlu1 %1066  ;;  %v1137_v24 = vrot.slane %v1136_v44, 1 }
 0x5b9   :  { %v1092_v41 = vmul.f32 %v2297_v13, %v1067_v25  ;;  %v1102_v13 = vrot.slane %v1101_v29, 1 }
 0x5ba   :  { %v1113_v19 = vadd.f32 %v1112_v39, %v1111_v11  ;;  %v1108_v48 = vadd.f32 %v1107_v38, %v1106_v36  ;;  %v1138_v25 = vadd.f32 %v1137_v24, %v1136_v44 }
 0x5bb   :  { %v1118_v47 = vsel %vm338_vm13, %v1092_v41, 0.0  ;;  %v1103_v30 = vadd.f32 %v1102_v13, %v1101_v29 }
 0x5bc   :  { %v1114_v56 = vrot.slane %v1113_v19, 2  ;;  %v1072_v2 = vpop.permute.xlu1 %1071  ;;  %v1119_v45 = vrot.slane %v1118_v47, 4  ;;  %v1109_v18 = vrot.slane %v1108_v48, 1 }
 0x5bd   :  { %v1093_v10 = vmul.f32 %v1072_v2, %v2303_v22  ;;  %v1153_v4 = vpack.c.bf16 %v1103_v30, %v1103_v30 }
 0x5be   :  { %v1115_v26 = vadd.f32 %v1114_v56, %v1113_v19  ;;  %v1120_v14 = vadd.f32 %v1119_v45, %v1118_v47  ;;  %v1110_v46 = vadd.f32 %v1109_v18, %v1108_v48  ;;  %v1158_v45 = vpack.c.bf16 %v1138_v25, %v1138_v25 }
 0x5bf   :  { %v1125_v34 = vsel %vm338_vm13, %v1093_v10, 0.0  ;;  %v1173_v47 = vunpack.c.l.b16 %v1153_v4 }
 0x5c0   :  { %v1126_v32 = vrot.slane %v1125_v34, 4  ;;  %v1082_v27 = vpop.permute.xlu1 %1081  ;;  %v1116_v28 = vrot.slane %v1115_v26, 1  ;;  %v1121_v58 = vrot.slane %v1120_v14, 2  ;;  %v1154_v62 = vpack.c.bf16 %v1110_v46, %v1110_v46 }
 0x5c1   :  { %v1095_v12 = vmul.f32 %v2301_v20, %v1082_v27  ;;  %v1178_v13 = vunpack.c.l.b16 %v1158_v45 }
 0x5c2   :  { %v1127_v54 = vadd.f32 %v1126_v32, %v1125_v34  ;;  %v1122_v60 = vadd.f32 %v1121_v58, %v1120_v14  ;;  %v1117_v16 = vadd.f32 %v1116_v28, %v1115_v26  ;;  %v1174_v0 = vunpack.c.l.b16 %v1154_v62 }
 0x5c3   :  { %v1139_v21 = vsel %vm338_vm13, %v1095_v12, 0.0 }
 0x5c4   :  { %v1128_v22 = vrot.slane %v1127_v54, 2  ;;  %v1140_v15 = vrot.slane %v1139_v21, 4  ;;  %v1087_v17 = vpop.permute.xlu1 %1086  ;;  %v1123_v50 = vrot.slane %v1122_v60, 1  ;;  %v1155_v36 = vpack.c.bf16 %v1117_v16, %v1117_v16 }
 0x5c5   :  { %v1096_v33 = vmul.f32 %v2305_v23, %v1087_v17  ;;  %v1181_v10 = vsel %vm502_vm14, %v1174_v0, %v1173_v47 }
 0x5c6   :  { %v1129_v43 = vadd.f32 %v1128_v22, %v1127_v54  ;;  %v1141_v57 = vadd.f32 %v1140_v15, %v1139_v21  ;;  %v1124_v31 = vadd.f32 %v1123_v50, %v1122_v60  ;;  %v1175_v42 = vunpack.c.l.b16 %v1155_v36 }
 0x5c7   :  { %v1146_v20 = vsel %vm338_vm13, %v1096_v33, 0.0 }
 0x5c8   :  { %v1130_v59 = vrot.slane %v1129_v43, 1  ;;  %v1142_v35 = vrot.slane %v1141_v57, 2  ;;  %v1147_v61 = vrot.slane %v1146_v20, 4  ;;  %v1156_v37 = vpack.c.bf16 %v1124_v31, %v1124_v31 }
 0x5c9   :  { %v1182_v14 = vsel %vm505_vm15, %v1175_v42, %v1181_v10 }
 0x5ca   :  { %v1131_v11 = vadd.f32 %v1130_v59, %v1129_v43  ;;  %v1143_v38 = vadd.f32 %v1142_v35, %v1141_v57  ;;  %v1148_v39 = vadd.f32 %v1147_v61, %v1146_v20  ;;  %v1176_v48 = vunpack.c.l.b16 %v1156_v37 }
 0x5cc   :  { %v1157_v41 = vpack.c.bf16 %v1131_v11, %v1131_v11  ;;  %v1144_v23 = vrot.slane %v1143_v38, 1  ;;  %v1149_v19 = vrot.slane %v1148_v39, 2  ;;  %v1183_v34 = vsel %vm508_vm0, %v1176_v48, %v1182_v14 }
 0x5ce   :  { %v1145_v56 = vadd.f32 %v1144_v23, %v1143_v38  ;;  %v1150_v2 = vadd.f32 %v1149_v19, %v1148_v39  ;;  %v1177_v29 = vunpack.c.l.b16 %v1157_v41 }
 0x5d0   :  { %v1159_v26 = vpack.c.bf16 %v1145_v56, %v1145_v56  ;;  %v1151_v49 = vrot.slane %v1150_v2, 1  ;;  %v1184_v32 = vsel %vm511_vm1, %v1177_v29, %v1183_v34 }
 0x5d1   :  { %v1185_v58 = vsel %vm514_vm2, %v1178_v13, %v1184_v32 }
 0x5d2   :  { %v1152_v18 = vadd.f32 %v1151_v49, %v1150_v2  ;;  %v1179_v27 = vunpack.c.l.b16 %v1159_v26 }
 0x5d4   :  { %v1160_v28 = vpack.c.bf16 %v1152_v18, %v1152_v18  ;;  %v1186_v54 = vsel %vm517_vm3, %v1179_v27, %v1185_v58 }
 0x5d6   :  { %v1180_v12 = vunpack.c.l.b16 %v1160_v28 }
 0x5d8   :  { %v1187_v44 = vsel %vm520_vm4, %v1180_v12, %v1186_v54 }
 0x5d9   :  { %v1188_v60 = vpack.c.b16 %v1187_v44, %v1187_v44 }
 0x5db   :  { %1953 = vmatmul.mubr.msk.bf16.vlgmr.msra.gmra.mxu1 %vm338_vm13, %v1188_v60 }
 0x5dc   :  { %1960 = vmatprep.mubr.msk.bf16.mxu1 %vm2054_vm12, %v2053_v40 }
 0x69b   :  { %v1238_v21 = vpop.f32.mrf.mxu1 }
 0x69c   :  { %v1246_v46 = vrot.slane %v1238_v21, 1  ;;  %v1247_v22 = vrot.slane %v1238_v21, 2  ;;  %v1248_v15 = vrot.slane %v1238_v21, 3  ;;  %v1249_v17 = vrot.slane %v1238_v21, 4 }
 0x69d   :  { %v1954_v30 = vpop.f32.mrf.mxu1  ;;  %v1250_v16 = vrot.slane %v1238_v21, 5  ;;  %v1251_v50 = vrot.slane %v1238_v21, 6  ;;  %v1252_v33 = vrot.slane %v1238_v21, 7  ;;  %v1261_v62 = vadd.f32 %v1238_v21, %v2215_v52 }
 0x69e   :  { %v1262_v43 = vadd.f32 %v1246_v46, %v2217_v53  ;;  %v1263_v57 = vadd.f32 %v1247_v22, %v2219_v55  ;;  %v1264_v24 = vadd.f32 %v1248_v15, %v2213_v51  ;;  %v1265_v20 = vadd.f32 %v1249_v17, %v2234_v1 }
 0x69f   :  { %v1241_v31 = vpop.f32.mrf.mxu1  ;;  %v1266_v59 = vadd.f32 %v1250_v16, %v2236_v3  ;;  %v1267_v36 = vadd.f32 %v1251_v50, %v2240_v9  ;;  %v1268_v37 = vadd.f32 %v1252_v33, %v2232_v63 }
 0x6a0   :  { %v1277_v35 = vrot.slane %v1262_v43, 7  ;;  %v1279_v61 = vrot.slane %v1263_v57, 6  ;;  %v1281_v11 = vrot.slane %v1264_v24, 5  ;;  %v1283_v51 = vrot.slane %v1265_v20, 4 }
 0x6a1   :  { %v1955_v4 = vpop.f32.mrf.mxu1  ;;  %v1285_v1 = vrot.slane %v1266_v59, 3  ;;  %v1287_v39 = vrot.slane %v1267_v36, 2  ;;  %v1289_v25 = vrot.slane %v1268_v37, 1 }
 0x6a2   :  { %v1278_v53 = vsel %vm502_vm14, %v1277_v35, %v1261_v62  ;;  %v2001_v35 = vld [vmem:[%s2562_s8] sm:$0xff]  }
 0x6a3   :  { %v1280_v55 = vsel %vm505_vm15, %v1279_v61, %v1278_v53 }
 0x6a4   :  { %v1282_v38 = vsel %vm508_vm0, %v1281_v11, %v1280_v55 }
 0x6a5   :  { %v1284_v52 = vsel %vm511_vm1, %v1283_v51, %v1282_v38 }
 0x6a6   :  { %v1286_v3 = vsel %vm514_vm2, %v1285_v1, %v1284_v52 }
 0x6a7   :  { %v1288_v0 = vsel %vm517_vm3, %v1287_v39, %v1286_v3 }
 0x6a8   :  { %v1290_v9 = vsel %vm520_vm4, %v1289_v25, %v1288_v0 }
 0x6a9   :  { %v1292_v63 = vsel %vm338_vm13, %v1290_v9, 0.0 }
 0x6aa   :  { %1293 = vadd.xlane.f32.xlu1 %v1292_v63 }
 0x733   :  { %v1294_v41 = vpop.xlane.xlu1 %1293 }
 0x734   :  { %v1296_v23 = vmul.f32 0.03125, %v1294_v41 }
 0x736   :  { %v1298_v19 = vrot.slane %v1296_v23, 1  ;;  %v1299_v42 = vrot.slane %v1296_v23, 2  ;;  %v1300_v47 = vrot.slane %v1296_v23, 3  ;;  %v1301_v48 = vrot.slane %v1296_v23, 4 }
 0x737   :  { %v1302_v56 = vrot.slane %v1296_v23, 5  ;;  %v1303_v2 = vrot.slane %v1296_v23, 6  ;;  %v1304_v29 = vrot.slane %v1296_v23, 7  ;;  %v1313_v45 = vsub.f32 %v1261_v62, %v1296_v23 }
 0x738   :  { %v1314_v10 = vsub.f32 %v1262_v43, %v1298_v19  ;;  %v1315_v26 = vsub.f32 %v1263_v57, %v1299_v42  ;;  %v1316_v49 = vsub.f32 %v1264_v24, %v1300_v47  ;;  %v1317_v14 = vsub.f32 %v1265_v20, %v1301_v48 }
 0x739   :  { %v1318_v34 = vsub.f32 %v1266_v59, %v1302_v56  ;;  %v1319_v18 = vsub.f32 %v1267_v36, %v1303_v2  ;;  %v1320_v32 = vsub.f32 %v1268_v37, %v1304_v29  ;;  %v1321_v12 = vmul.f32 %v1313_v45, %v1313_v45  ;;  %v2000_v59 = vld [vmem:[%s2562_s8 + $0x8] sm:$0xff]   ;;  %v2454_v37 = vld [vmem:[%s2564_s10] sm:$0xf] }
 0x73a   :  { %v1322_v27 = vmul.f32 %v1314_v10, %v1314_v10  ;;  %v1323_v13 = vmul.f32 %v1315_v26, %v1315_v26  ;;  %v1324_v28 = vmul.f32 %v1316_v49, %v1316_v49  ;;  %v1325_v58 = vmul.f32 %v1317_v14, %v1317_v14  ;;  %1957 = vmatpush3.bf16.msra.mxu1 %v2000_v59 }
 0x73b   :  { %v1326_v54 = vmul.f32 %v1318_v34, %v1318_v34  ;;  %v1327_v21 = vmul.f32 %v1319_v18, %v1319_v18  ;;  %v1328_v46 = vmul.f32 %v1320_v32, %v1320_v32  ;;  %1958 = vmatprep.subr.bf16.mxu1 %v2053_v40  ;;  %v1385_v11 = vrot.slane %v2454_v37, %v2130_v5 }
 0x73c   :  { %v1337_v44 = vrot.slane %v1322_v27, 7  ;;  %v1339_v60 = vrot.slane %v1323_v13, 6  ;;  %v1341_v15 = vrot.slane %v1324_v28, 5  ;;  %v1343_v30 = vrot.slane %v1325_v58, 4 }
 0x73d   :  { %v1345_v50 = vrot.slane %v1326_v54, 3  ;;  %v1347_v43 = vrot.slane %v1327_v21, 2  ;;  %v1349_v24 = vrot.slane %v1328_v46, 1  ;;  %v1397_v55 = vrot.slane %v2454_v37, %v2139_v8 }
 0x73e   :  { %v1338_v22 = vsel %vm502_vm14, %v1337_v44, %v1321_v12  ;;  %1959 = vmatpush3.bf16.msra.mxu1 %v2001_v35 }
 0x73f   :  { %v1340_v17 = vsel %vm505_vm15, %v1339_v60, %v1338_v22 }
 0x740   :  { %v1342_v16 = vsel %vm508_vm0, %v1341_v15, %v1340_v17 }
 0x741   :  { %v1344_v33 = vsel %vm511_vm1, %v1343_v30, %v1342_v16 }
 0x742   :  { %v1346_v57 = vsel %vm514_vm2, %v1345_v50, %v1344_v33 }
 0x743   :  { %v1348_v31 = vsel %vm517_vm3, %v1347_v43, %v1346_v57 }
 0x744   :  { %v1350_v20 = vsel %vm520_vm4, %v1349_v24, %v1348_v31 }
 0x745   :  { %v1352_v62 = vsel %vm338_vm13, %v1350_v20, 0.0 }
 0x746   :  { %1353 = vadd.xlane.f32.xlu0 %v1352_v62 }
 0x7cf   :  { %v1354_v61 = vpop.xlane.xlu0 %1353 }
 0x7d0   :  { %v1355_v4 = vmul.f32 0.03125, %v1354_v61 }
 0x7d2   :  { %v1356_v36 = vadd.f32 1e-12, %v1355_v4 }
 0x7d4   :  { %2024 = vrsqrt.f32 %v1356_v36 }
 0x7e1   :  { %v2025_v53 = vpop.eup %2024 }
 0x7e2   :  { %v1359_v51 = vrot.slane %v2025_v53, 1  ;;  %v1360_v38 = vrot.slane %v2025_v53, 2  ;;  %v1361_v1 = vrot.slane %v2025_v53, 3  ;;  %v1362_v52 = vrot.slane %v2025_v53, 4 }
 0x7e3   :  { %v1363_v39 = vrot.slane %v2025_v53, 5  ;;  %v1364_v3 = vrot.slane %v2025_v53, 6  ;;  %v1365_v25 = vrot.slane %v2025_v53, 7  ;;  %v1374_v0 = vmul.f32 %v2025_v53, %v1313_v45 }
 0x7e4   :  { %v1375_v9 = vmul.f32 %v1359_v51, %v1314_v10  ;;  %v1376_v63 = vmul.f32 %v1360_v38, %v1315_v26  ;;  %v1377_v41 = vmul.f32 %v1361_v1, %v1316_v49  ;;  %v1378_v23 = vmul.f32 %v1362_v52, %v1317_v14  ;;  %v2002_v1 = vld [vmem:[%s2563_s9 + $0x18] sm:$0xff]   ;;  %v2003_v52 = vld [vmem:[%s2563_s9 + $0x10] sm:$0xff]  }
 0x7e5   :  { %v1379_v19 = vmul.f32 %v1363_v39, %v1318_v34  ;;  %v1380_v42 = vmul.f32 %v1364_v3, %v1319_v18  ;;  %v1381_v47 = vmul.f32 %v1365_v25, %v1320_v32  ;;  %v1386_v48 = vmul.f32 %v1385_v11, %v1374_v0  ;;  %1965 = vmatpush3.bf16.msra.mxu0 %v2002_v1  ;;  %v2004_v39 = vld [vmem:[%s2563_s9 + $0x8] sm:$0xff]   ;;  %v2005_v3 = vld [vmem:[%s2563_s9] sm:$0xff]   ;;  %s2057_s9 = smov [#allocation2]  }
 0x7e6   :  { %v1387_v5 = vmul.f32 %v1385_v11, %v1375_v9  ;;  %v1388_v56 = vmul.f32 %v1385_v11, %v1376_v63  ;;  %v1389_v2 = vmul.f32 %v1385_v11, %v1377_v41  ;;  %v1390_v8 = vmul.f32 %v1385_v11, %v1378_v23  ;;  %1966 = vmatprep.subr.bf16.mxu0 %v2053_v40  ;;  %s1780_s19 = sshll.u32 %s2057_s9, 4  ;;  %s1781_s19 = int_to_ptr.vmem [resolvable:$true] %s1780_s19 }
 0x7e7   :  { %v1391_v29 = vmul.f32 %v1385_v11, %v1379_v19  ;;  %v1392_v27 = vmul.f32 %v1385_v11, %v1380_v42  ;;  %v1393_v13 = vmul.f32 %v1385_v11, %v1381_v47  ;;  %v2460_v28 = vadd.f32 %v1397_v55, %v1386_v48  ;;  %s2030_s20 = scalar_lea.vmem %s1781_s19, 128  ;;  %p2035_p1 = scmp.lt.s32.totalorder %s1781_s19, %s1781_s19 }
 0x7e8   :  { %v2462_v58 = vadd.f32 %v1397_v55, %v1387_v5  ;;  %v2464_v45 = vadd.f32 %v1397_v55, %v1388_v56  ;;  %v2466_v10 = vadd.f32 %v1397_v55, %v1389_v2  ;;  %v2468_v26 = vadd.f32 %v1397_v55, %v1390_v8  ;;  %p2031_p0 = scmp.ne.s32.totalorder %s1781_s19, %s2030_s20  ;;  %p2036_p2 = scmp.lt.s32.totalorder %s2030_s20, %s2030_s20 }
 0x7e9   :  { %v2470_v49 = vadd.f32 %v1397_v55, %v1391_v29  ;;  %v2472_v14 = vadd.f32 %v1397_v55, %v1392_v27  ;;  %v2474_v34 = vadd.f32 %v1397_v55, %v1393_v13  ;;  %v1406_v18 = vpack.c.bf16 %v2460_v28, %v2460_v28  ;;  %1967 = vmatpush3.bf16.msra.mxu0 %v2003_v52 }
 0x7ea   :  { %v1407_v32 = vpack.c.bf16 %v2462_v58, %v2462_v58  ;;  %v1408_v12 = vpack.c.bf16 %v2464_v45, %v2464_v45  ;;  %v1409_v54 = vpack.c.bf16 %v2466_v10, %v2466_v10  ;;  %v1410_v44 = vpack.c.bf16 %v2468_v26, %v2468_v26  ;;  %1968 = vmatprep.subr.bf16.mxu0 %v2053_v40  ;;  %p2037_p3 = por %p2036_p2, %p2035_p1 }
 0x7eb   :  { %v1411_v60 = vpack.c.bf16 %v2470_v49, %v2470_v49  ;;  %v1412_v21 = vpack.c.bf16 %v2472_v14, %v2472_v14  ;;  %v1413_v46 = vpack.c.bf16 %v2474_v34, %v2474_v34  ;;  %v1426_v16 = vunpack.c.l.b16 %v1406_v18 }
 0x7ec   :  { %v1427_v22 = vunpack.c.l.b16 %v1407_v32  ;;  %v1428_v15 = vunpack.c.l.b16 %v1408_v12  ;;  %v1429_v17 = vunpack.c.l.b16 %v1409_v54  ;;  %v1430_v30 = vunpack.c.l.b16 %v1410_v44  ;;  %p2038_p4 = pnand %p2037_p3, %p2031_p0 }
 0x7ed   :  { %v1431_v50 = vunpack.c.l.b16 %v1411_v60  ;;  %v1432_v57 = vunpack.c.l.b16 %v1412_v21  ;;  %v1433_v24 = vunpack.c.l.b16 %v1413_v46  ;;  %1969 = vmatpush3.bf16.msra.mxu0 %v2004_v39 }
 0x7ee   :  { %v1434_v33 = vrot.slane %v1427_v22, 7  ;;  %v1436_v43 = vrot.slane %v1428_v15, 6  ;;  %v1438_v20 = vrot.slane %v1429_v17, 5  ;;  %v1440_v59 = vrot.slane %v1430_v30, 4  ;;  %1970 = vmatprep.subr.bf16.mxu0 %v2053_v40 }
 0x7ef   :  { %v1442_v61 = vrot.slane %v1431_v50, 3  ;;  %v1444_v36 = vrot.slane %v1432_v57, 2  ;;  %v1446_v11 = vrot.slane %v1433_v24, 1 }
 0x7f0   :  { %v1435_v31 = vsel %vm502_vm14, %v1434_v33, %v1426_v16 }
 0x7f1   :  { %v1437_v62 = vsel %vm505_vm15, %v1436_v43, %v1435_v31  ;;  %1971 = vmatpush3.bf16.msra.mxu0 %v2005_v3 }
 0x7f2   :  { %v1439_v35 = vsel %vm508_vm0, %v1438_v20, %v1437_v62 }
 0x7f3   :  { %v1441_v4 = vsel %vm511_vm1, %v1440_v59, %v1439_v35 }
 0x7f4   :  { %v1443_v53 = vsel %vm514_vm2, %v1442_v61, %v1441_v4 }
 0x7f5   :  { %v1445_v55 = vsel %vm517_vm3, %v1444_v36, %v1443_v53 }
 0x7f6   :  { %v1447_v51 = vsel %vm520_vm4, %v1446_v11, %v1445_v55 }
 0x7f7   :  { %v1448_v38 = vpack.c.b16 %v1447_v51, %v1447_v51 }
 0x7f9   :  { %1961 = vmatmul.mubr.msk.bf16.vlgmr.msra.gmra.mxu1 %vm338_vm13, %v1448_v38 }
 0x8b9   :  { %v1498_v25 = vpop.f32.mrf.mxu1 }
 0x8ba   :  { %v1504_v0 = vmul.f32 %v1498_v25, %v1498_v25 }
 0x8bb   :  { %v1962_v9 = vpop.f32.mrf.mxu1 }
 0x8bc   :  { %v1505_v63 = vmul.f32 %v1504_v0, %v1498_v25 }
 0x8bd   :  { %v1501_v41 = vpop.f32.mrf.mxu1 }
 0x8be   :  { %v1506_v23 = vmul.f32 0.044715, %v1505_v63 }
 0x8bf   :  { %v1963_v19 = vpop.f32.mrf.mxu1 }
 0x8c0   :  { %v1507_v42 = vadd.f32 %v1506_v23, %v1498_v25 }
 0x8c2   :  { %v1508_v47 = vmul.f32 0.7978846, %v1507_v42 }
 0x8c4   :  { %2026 = vtanh.f32 %v1508_v47 }
 0x8d1   :  { %v2027_v48 = vpop.eup %2026 }
 0x8d2   :  { %v1510_v5 = vadd.f32 1.0, %v2027_v48 }
 0x8d4   :  { %v1511_v56 = vmul.f32 0.5, %v1510_v5 }
 0x8d6   :  { %v1512_v2 = vmul.f32 %v1511_v56, %v1498_v25 }
 0x8d8   :  { %v1513_v8 = vpack.c.bf16 %v1512_v2, %v1512_v2 }
 0x8da   :  { %1973 = vmatmul.mubr.msk.bf16.vlgmr.msra.gmra.mxu0 %vm1546_vm6, %v1513_v8 }
 0x99a   :  { %v1584_v29 = vpop.f32.mrf.mxu0 }
 0x99b   :  { %v1591_v40 = vrot.slane %v1584_v29, 1  ;;  %v1592_v27 = vrot.slane %v1584_v29, 2  ;;  %v1593_v13 = vrot.slane %v1584_v29, 3  ;;  %v1594_v18 = vrot.slane %v1584_v29, 4 }
 0x99c   :  { %v1974_v32 = vpop.f32.mrf.mxu0  ;;  %v1595_v12 = vrot.slane %v1584_v29, 5  ;;  %v1596_v54 = vrot.slane %v1584_v29, 6  ;;  %v1597_v44 = vrot.slane %v1584_v29, 7  ;;  %v1606_v17 = vadd.f32 %v1584_v29, %v2460_v28 }
 0x99d   :  { %v1607_v60 = vadd.f32 %v1591_v40, %v2462_v58  ;;  %v1608_v21 = vadd.f32 %v1592_v27, %v2464_v45  ;;  %v1609_v46 = vadd.f32 %v1593_v13, %v2466_v10  ;;  %v1610_v15 = vadd.f32 %v1594_v18, %v2468_v26 }
 0x99e   :  { %v1587_v22 = vpop.f32.mrf.mxu0  ;;  %v1611_v30 = vadd.f32 %v1595_v12, %v2470_v49  ;;  %v1612_v43 = vadd.f32 %v1596_v54, %v2472_v14  ;;  %v1613_v57 = vadd.f32 %v1597_v44, %v2474_v34 }
 0x99f   :  { %v1622_v16 = vrot.slane %v1607_v60, 7  ;;  %v1624_v50 = vrot.slane %v1608_v21, 6  ;;  %v1626_v24 = vrot.slane %v1609_v46, 5  ;;  %v1628_v10 = vrot.slane %v1610_v15, 4 }
 0x9a0   :  { %v1975_v33 = vpop.f32.mrf.mxu0  ;;  %v1630_v26 = vrot.slane %v1611_v30, 3  ;;  %v1632_v20 = vrot.slane %v1612_v43, 2  ;;  %v1634_v62 = vrot.slane %v1613_v57, 1 }
 0x9a1   :  { %v1623_v58 = vsel %vm502_vm14, %v1622_v16, %v1606_v17  ;;  %v1741_v33 = vrot.slane %v2454_v37, %v2136_v7 }
 0x9a2   :  { %v1625_v45 = vsel %vm505_vm15, %v1624_v50, %v1623_v58  ;;  %v1729_v50 = vrot.slane %v2454_v37, %v2133_v6 }
 0x9a3   :  { %v1627_v31 = vsel %vm508_vm0, %v1626_v24, %v1625_v45 }
 0x9a4   :  { %v1629_v28 = vsel %vm511_vm1, %v1628_v10, %v1627_v31 }
 0x9a5   :  { %v1631_v49 = vsel %vm514_vm2, %v1630_v26, %v1629_v28 }
 0x9a6   :  { %v1633_v59 = vsel %vm517_vm3, %v1632_v20, %v1631_v49 }
 0x9a7   :  { %v1635_v14 = vsel %vm520_vm4, %v1634_v62, %v1633_v59 }
 0x9a8   :  { %v1637_v34 = vsel %vm338_vm13, %v1635_v14, 0.0 }
 0x9a9   :  { %1638 = vadd.xlane.f32.xlu1 %v1637_v34 }
 0xa32   :  { %v1639_v35 = vpop.xlane.xlu1 %1638 }
 0xa33   :  { %v1640_v61 = vmul.f32 0.03125, %v1639_v35 }
 0xa35   :  { %v1642_v4 = vrot.slane %v1640_v61, 1  ;;  %v1643_v36 = vrot.slane %v1640_v61, 2  ;;  %v1644_v53 = vrot.slane %v1640_v61, 3  ;;  %v1645_v11 = vrot.slane %v1640_v61, 4 }
 0xa36   :  { %v1646_v55 = vrot.slane %v1640_v61, 5  ;;  %v1647_v51 = vrot.slane %v1640_v61, 6  ;;  %v1648_v38 = vrot.slane %v1640_v61, 7  ;;  %v1657_v1 = vsub.f32 %v1606_v17, %v1640_v61 }
 0xa37   :  { %v1658_v52 = vsub.f32 %v1607_v60, %v1642_v4  ;;  %v1659_v39 = vsub.f32 %v1608_v21, %v1643_v36  ;;  %v1660_v3 = vsub.f32 %v1609_v46, %v1644_v53  ;;  %v1661_v25 = vsub.f32 %v1610_v15, %v1645_v11 }
 0xa38   :  { %v1662_v0 = vsub.f32 %v1611_v30, %v1646_v55  ;;  %v1663_v9 = vsub.f32 %v1612_v43, %v1647_v51  ;;  %v1664_v63 = vsub.f32 %v1613_v57, %v1648_v38  ;;  %v1665_v47 = vmul.f32 %v1657_v1, %v1657_v1 }
 0xa39   :  { %v1666_v41 = vmul.f32 %v1658_v52, %v1658_v52  ;;  %v1667_v23 = vmul.f32 %v1659_v39, %v1659_v39  ;;  %v1668_v19 = vmul.f32 %v1660_v3, %v1660_v3  ;;  %v1669_v42 = vmul.f32 %v1661_v25, %v1661_v25 }
 0xa3a   :  { %v1670_v48 = vmul.f32 %v1662_v0, %v1662_v0  ;;  %v1671_v2 = vmul.f32 %v1663_v9, %v1663_v9  ;;  %v1672_v8 = vmul.f32 %v1664_v63, %v1664_v63 }
 0xa3b   :  { %v1681_v5 = vrot.slane %v1666_v41, 7  ;;  %v1683_v56 = vrot.slane %v1667_v23, 6  ;;  %v1685_v40 = vrot.slane %v1668_v19, 5  ;;  %v1687_v13 = vrot.slane %v1669_v42, 4 }
 0xa3c   :  { %v1689_v32 = vrot.slane %v1670_v48, 3  ;;  %v1691_v54 = vrot.slane %v1671_v2, 2  ;;  %v1693_v60 = vrot.slane %v1672_v8, 1 }
 0xa3d   :  { %v1682_v29 = vsel %vm502_vm14, %v1681_v5, %v1665_v47 }
 0xa3e   :  { %v1684_v27 = vsel %vm505_vm15, %v1683_v56, %v1682_v29 }
 0xa3f   :  { %v1686_v18 = vsel %vm508_vm0, %v1685_v40, %v1684_v27 }
 0xa40   :  { %v1688_v12 = vsel %vm511_vm1, %v1687_v13, %v1686_v18 }
 0xa41   :  { %v1690_v44 = vsel %vm514_vm2, %v1689_v32, %v1688_v12 }
 0xa42   :  { %v1692_v21 = vsel %vm517_vm3, %v1691_v54, %v1690_v44 }
 0xa43   :  { %v1694_v46 = vsel %vm520_vm4, %v1693_v60, %v1692_v21 }
 0xa44   :  { %v1696_v22 = vsel %vm338_vm13, %v1694_v46, 0.0 }
 0xa45   :  { %1697 = vadd.xlane.f32.xlu1 %v1696_v22 }
 0xace   :  { %v1698_v15 = vpop.xlane.xlu1 %1697 }
 0xacf   :  { %v1699_v17 = vmul.f32 0.03125, %v1698_v15 }
 0xad1   :  { %v1700_v30 = vadd.f32 1e-12, %v1699_v17 }
 0xad3   :  { %2028 = vrsqrt.f32 %v1700_v30 }
 0xae0   :  { %v2029_v16 = vpop.eup %2028 }
 0xae1   :  { %v1703_v43 = vrot.slane %v2029_v16, 1  ;;  %v1704_v57 = vrot.slane %v2029_v16, 2  ;;  %v1705_v58 = vrot.slane %v2029_v16, 3  ;;  %v1706_v24 = vrot.slane %v2029_v16, 4 }
 0xae2   :  { %v1707_v45 = vrot.slane %v2029_v16, 5  ;;  %v1708_v10 = vrot.slane %v2029_v16, 6  ;;  %v1709_v31 = vrot.slane %v2029_v16, 7  ;;  %v1718_v26 = vmul.f32 %v2029_v16, %v1657_v1 }
 0xae3   :  { %v1719_v28 = vmul.f32 %v1703_v43, %v1658_v52  ;;  %v1720_v20 = vmul.f32 %v1704_v57, %v1659_v39  ;;  %v1721_v49 = vmul.f32 %v1705_v58, %v1660_v3  ;;  %v1722_v62 = vmul.f32 %v1706_v24, %v1661_v25 }
 0xae4   :  { %v1723_v59 = vmul.f32 %v1707_v45, %v1662_v0  ;;  %v1724_v14 = vmul.f32 %v1708_v10, %v1663_v9  ;;  %v1725_v34 = vmul.f32 %v1709_v31, %v1664_v63  ;;  %v1730_v35 = vmul.f32 %v1729_v50, %v1718_v26 }
 0xae5   :  { %v1731_v6 = vmul.f32 %v1729_v50, %v1719_v28  ;;  %v1732_v61 = vmul.f32 %v1729_v50, %v1720_v20  ;;  %v1733_v4 = vmul.f32 %v1729_v50, %v1721_v49  ;;  %v1734_v7 = vmul.f32 %v1729_v50, %v1722_v62 }
 0xae6   :  { %v1735_v37 = vmul.f32 %v1729_v50, %v1723_v59  ;;  %v1736_v36 = vmul.f32 %v1729_v50, %v1724_v14  ;;  %v1737_v53 = vmul.f32 %v1729_v50, %v1725_v34  ;;  %v1742_v1 = vadd.f32 %v1741_v33, %v1730_v35 }
 0xae7   :  { %v1743_v11 = vadd.f32 %v1741_v33, %v1731_v6  ;;  %v1744_v55 = vadd.f32 %v1741_v33, %v1732_v61  ;;  %v1745_v51 = vadd.f32 %v1741_v33, %v1733_v4  ;;  %v1746_v38 = vadd.f32 %v1741_v33, %v1734_v7 }
 0xae8   :  { %v1747_v52 = vadd.f32 %v1741_v33, %v1735_v37  ;;  %v1748_v25 = vadd.f32 %v1741_v33, %v1736_v36  ;;  %v1749_v0 = vadd.f32 %v1741_v33, %v1737_v53 }
 0xae9   :  { %v1758_v39 = vrot.slane %v1743_v11, 7  ;;  %v1760_v3 = vrot.slane %v1744_v55, 6  ;;  %v1762_v63 = vrot.slane %v1745_v51, 5  ;;  %v1764_v23 = vrot.slane %v1746_v38, 4 }
 0xaea   :  { %v1766_v42 = vrot.slane %v1747_v52, 3  ;;  %v1768_v48 = vrot.slane %v1748_v25, 2  ;;  %v1770_v56 = vrot.slane %v1749_v0, 1 }
 0xaeb   :  { %v1759_v9 = vsel %vm502_vm14, %v1758_v39, %v1742_v1 }
 0xaec   :  { %v1761_v41 = vsel %vm505_vm15, %v1760_v3, %v1759_v9 }
 0xaed   :  { %v1763_v19 = vsel %vm508_vm0, %v1762_v63, %v1761_v41 }
 0xaee   :  { %v1765_v47 = vsel %vm511_vm1, %v1764_v23, %v1763_v19 }
 0xaef   :  { %v1767_v5 = vsel %vm514_vm2, %v1766_v42, %v1765_v47 }
 0xaf0   :  { %v1769_v2 = vsel %vm517_vm3, %v1768_v48, %v1767_v5 }
 0xaf1   :  { %v1771_v8 = vsel %vm520_vm4, %v1770_v56, %v1769_v2 }
 0xaf2   :  { %1773 = vst.msk [vmem:[#allocation2] sm:$0xff] %vm338_vm13, %v1771_v8 }
 0xaf3   :  { %2041 = shalt.err (!%p2038_p4)
}
 0xaf4   :  { %1783 = dma.vmem_to_hbm [thread:$0]  %s1781_s19, 128, %s2565_s11, [#allocation3]  }
 0xaf5   :  { %2050 = dma.done.wait [#allocation3], 128  }
 0xaf6   :  { %2051 = vsyncadd [#allocation3], 4294967168 }
 0xaf7   :  { %1787 = vsyncpa [#allocation3], 1 }

</bundles_post_ra>
